<compile_context>
chip_gen: v7x
topology: tpu7x:2x2x1
jax: 0.10.0
libtpu: 0.0.40
codegen_flags: <defaults>
</compile_context>

<pallas_src>
import jax
import jax.numpy as jnp
from jax import lax
from jax.experimental import pallas as pl
from jax.experimental.pallas import tpu as pltpu


def _round_up(x, m):
    return ((x + m - 1) // m) * m


# ------------------------------ Pallas kernel ------------------------------ #
def _make_fused_convrelu2_kernel(G, Wp, S):
    """Two chained 3x3 'same' conv + bias + ReLU stages on a flat padded layout.

    Activations are (C, SA) where SA is the lane-aligned flattened (Hp, Wp)
    padded image (row-major, p = ip*Wp + jp), staged inside a wider guard buffer
    so that conv tap (dy, dx) is the lane-offset slice starting at
    G + (dy-1)*Wp + (dx-1).  Each conv is one im2col-stacked MXU matmul.
    """

    def kernel(u_ref, mask_ref, w1_ref, b1_ref, w2_ref, b2_ref,
               o_ref, ubuf_ref, mid_ref, col1_ref, col2_ref):
        # u_ref:    (1, Cin, S)      bf16  upsampled activation, flat, zero halo
        # mask_ref: (1, SA)          f32   1.0 on interior pixels, 0.0 on halo/tail
        # w1_ref:   (Cmid, 9*Cin)    bf16  conv1 weights, taps stacked along K
        # b1_ref:   (Cmid, 1)        f32
        # w2_ref:   (Cout, 9*Cmid)   bf16  conv2 weights, taps stacked along K
        # b2_ref:   (Cout, 1)        f32
        # o_ref:    (1, Cout, SA)    f32   flat padded conv2 output (wrapper crops)
        # ubuf_ref: (Cin, BUFW)      bf16  guard-padded staging of u (VMEM)
        # mid_ref:  (Cmid, BUFW)     bf16  guard-padded conv1 activation (VMEM)
        # col1_ref: (9*Cin, SA)      bf16  conv1 im2col stack (VMEM)
        # col2_ref: (9*Cmid, SA)     bf16  conv2 im2col stack (VMEM)
        Cin = u_ref.shape[1]
        Cmid, BUFW = mid_ref.shape
        Cout, SA = o_ref.shape[1], o_ref.shape[2]

        # --- Stage the upsampled activation into the guard-padded flat buffer.
        # Guard/tail lanes are (re)zeroed every step — see header comment for why
        # this is not hoisted to a program_id==0 init (megacore per-core scratch).
        ubuf_ref[:, 0:G] = jnp.zeros((Cin, G), ubuf_ref.dtype)
        ubuf_ref[:, G + S:BUFW] = jnp.zeros((Cin, BUFW - G - S), ubuf_ref.dtype)
        ubuf_ref[:, G:G + S] = u_ref[0]
        mid_ref[:, 0:G] = jnp.zeros((Cmid, G), mid_ref.dtype)
        mid_ref[:, G + SA:BUFW] = jnp.zeros((Cmid, BUFW - G - SA), mid_ref.dtype)

        # --------- ConvRelu #1: im2col-to-K, ONE matmul, f32 vreg result --------
        for k in range(9):
            dy, dx = k // 3, k % 3
            off = (dy - 1) * Wp + (dx - 1)
            col1_ref[k * Cin:(k + 1) * Cin, :] = ubuf_ref[:, G + off:G + off + SA]
        acc1 = jnp.dot(w1_ref[...], col1_ref[...],
                       preferred_element_type=jnp.float32)          # (Cmid, SA)
        # bias + ReLU + zero the 1-pixel halo ring / lane tail (this IS conv2's
        # zero padding); mask is 0/1 so a single multiply suffices.
        mid = jnp.maximum(acc1 + b1_ref[...], 0.0) * mask_ref[...]
        mid_ref[:, G:G + SA] = mid.astype(mid_ref.dtype)            # single bf16 store

        # --------- ConvRelu #2: same trick; single store into the output --------
        for k in range(9):
            dy, dx = k // 3, k % 3
            off = (dy - 1) * Wp + (dx - 1)
            col2_ref[k * Cmid:(k + 1) * Cmid, :] = mid_ref[:, G + off:G + off + SA]
        acc2 = jnp.dot(w2_ref[...], col2_ref[...],
                       preferred_element_type=jnp.float32)          # (Cout, SA)
        o_ref[0] = jnp.maximum(acc2 + b2_ref[...], 0.0).astype(o_ref.dtype)

    return kernel


# ------------------------------ JAX wrapper -------------------------------- #
def _bilinear_x2_matrix_padded(in_size):
    """(2*in+2, in) matrix: bilinear x2 upsample (align_corners=False) rows,
    framed by one zero row on each side (this becomes the conv 'same' halo)."""
    out_size = 2 * in_size
    dst = jnp.arange(out_size, dtype=jnp.float32)
    src = jnp.maximum((dst + 0.5) / 2.0 - 0.5, 0.0)
    i0 = jnp.minimum(jnp.floor(src).astype(jnp.int32), in_size - 1)
    i1 = jnp.minimum(i0 + 1, in_size - 1)
    frac = src - i0.astype(jnp.float32)
    rows = jnp.arange(out_size)
    R = jnp.zeros((out_size, in_size), jnp.float32)
    R = R.at[rows, i0].add(1.0 - frac)
    R = R.at[rows, i1].add(frac)
    return jnp.pad(R, ((1, 1), (0, 0)))


@jax.jit
def decoder_block_v2_forward(x_nchw, w1, b1, w2, b2):
    """DecoderBlockV2 ('interpolate'). x: (N, Cin, H, W) NCHW; w: HWIO (3,3,Ci,Co)."""
    N, Cin, H, W = x_nchw.shape
    Cmid, Cout = w1.shape[-1], w2.shape[-1]
    Hu, Wu = 2 * H, 2 * W                        # upsampled size
    Hp, Wp = Hu + 2, Wu + 2                      # + 1-pixel conv halo
    S = Hp * Wp                                  # flat padded spatial
    SA = _round_up(S, 128)                       # lane-aligned compute width
    G = _round_up(Wp + 1, 128)                   # guard so taps are plain slices
    BUFW = G + _round_up(SA + Wp + 1, 128)       # guard-padded VMEM buffer width

    # Bilinear x2 upsample (align_corners=False) as two separable matmuls whose
    # matrices already carry the conv 'same' zero halo.  Result is the tight flat
    # (N, Cin, S) layout — no jnp.pad-to-guard HBM pass (guard lives in VMEM).
    Rh = _bilinear_x2_matrix_padded(H)           # (Hp, H)
    Rw = _bilinear_x2_matrix_padded(W)           # (Wp, W)
    x = x_nchw.astype(jnp.float32)
    up = jnp.einsum('nchw,qw->nchq', x, Rw)
    up = jnp.einsum('nchq,ph->ncpq', up, Rh)     # (N, Cin, Hp, Wp), halo == 0
    u = up.reshape(N, Cin, S).astype(jnp.bfloat16)   # contiguous reshape is free

    # Interior mask over the flat padded image (1 inside Hu x Wu, 0 elsewhere).
    p = jnp.arange(SA)
    row, col = p // Wp, p % Wp
    interior = (p < S) & (row >= 1) & (row <= Hp - 2) & (col >= 1) & (col <= Wp - 2)
    mask = interior.astype(jnp.float32).reshape(1, SA)

    # Conv weights with the 9 taps stacked along the contraction axis:
    # w_k[o, (dy*3+dx)*Ci + c] = w[dy, dx, c, o]  →  one K=9*Ci matmul per conv.
    w1_k = jnp.transpose(w1, (3, 0, 1, 2)).reshape(Cmid, 9 * Cin).astype(jnp.bfloat16)
    w2_k = jnp.transpose(w2, (3, 0, 1, 2)).reshape(Cout, 9 * Cmid).astype(jnp.bfloat16)
    b1_k = b1.reshape(Cmid, 1).astype(jnp.float32)
    b2_k = b2.reshape(Cout, 1).astype(jnp.float32)

    out_flat = pl.pallas_call(
        _make_fused_convrelu2_kernel(G, Wp, S),
        out_shape=jax.ShapeDtypeStruct((N, Cout, SA), jnp.float32),
        grid=(N,),
        in_specs=[
            pl.BlockSpec((1, Cin, S), lambda n: (n, 0, 0)),
            pl.BlockSpec((1, SA), lambda n: (0, 0)),
            pl.BlockSpec((Cmid, 9 * Cin), lambda n: (0, 0)),
            pl.BlockSpec((Cmid, 1), lambda n: (0, 0)),
            pl.BlockSpec((Cout, 9 * Cmid), lambda n: (0, 0)),
            pl.BlockSpec((Cout, 1), lambda n: (0, 0)),
        ],
        out_specs=pl.BlockSpec((1, Cout, SA), lambda n: (n, 0, 0)),
        scratch_shapes=[
            pltpu.VMEM((Cin, BUFW), jnp.bfloat16),     # guard-padded upsampled act
            pltpu.VMEM((Cmid, BUFW), jnp.bfloat16),    # mid activation stays in VMEM
            pltpu.VMEM((9 * Cin, SA), jnp.bfloat16),   # conv1 im2col (K-stacked taps)
            pltpu.VMEM((9 * Cmid, SA), jnp.bfloat16),  # conv2 im2col
        ],
        compiler_params=pltpu.CompilerParams(
            dimension_semantics=("parallel",)),        # batch across TCs (v7x: 2/chip)
    )(u, mask, w1_k, b1_k, w2_k, b2_k)

    # Crop the lane-alignment tail and the 1-pixel halo ring; output stays NCHW.
    out = out_flat[:, :, :S].reshape(N, Cout, Hp, Wp)
    return out[:, :, 1:-1, 1:-1]


# ------------------------------- reference --------------------------------- #
def _bilinear_upsample_x2_ref(x):
    """(N, C, H, W) -> (N, C, 2H, 2W); PyTorch align_corners=False, gather-based."""
    N, C, H, W = x.shape

    def src_idx(out_size, in_size):
        dst = jnp.arange(out_size, dtype=jnp.float32)
        src = jnp.maximum((dst + 0.5) / 2.0 - 0.5, 0.0)
        i0 = jnp.minimum(jnp.floor(src).astype(jnp.int32), in_size - 1)
        i1 = jnp.minimum(i0 + 1, in_size - 1)
        return i0, i1, src - i0.astype(jnp.float32)

    h0, h1, fh = src_idx(2 * H, H)
    w0, w1, fw = src_idx(2 * W, W)
    fh_ = fh[None, None, :, None]
    fw_ = fw[None, None, None, :]
    top = x[:, :, h0][:, :, :, w0] * (1 - fw_) + x[:, :, h0][:, :, :, w1] * fw_
    bot = x[:, :, h1][:, :, :, w0] * (1 - fw_) + x[:, :, h1][:, :, :, w1] * fw_
    return top * (1 - fh_) + bot * fh_


def _reference_forward(x_nchw, w1, b1, w2, b2):
    x = _bilinear_upsample_x2_ref(x_nchw.astype(jnp.float32))
    dn = ('NCHW', 'HWIO', 'NCHW')
    x = jax.nn.relu(lax.conv_general_dilated(x, w1, (1, 1), 'SAME',
                                             dimension_numbers=dn)
                    + b1[None, :, None, None])
    x = jax.nn.relu(lax.conv_general_dilated(x, w2, (1, 1), 'SAME',
                                             dimension_numbers=dn)
                    + b2[None, :, None, None])
    return x


# ---------------------------------- main ------------------------------------ #
if __name__ == "__main__":
    key = jax.random.PRNGKey(0)
    k1, k2, k3, k4, k5 = jax.random.split(key, 5)

    # Small shapes: batch=2, in_channels=4, middle=8, out=4, spatial=16x16.
    N, Cin, H, W = 2, 4, 16, 16
    Cmid, Cout = 8, 4

    x = jax.random.normal(k1, (N, Cin, H, W), jnp.float32)             # NCHW input
    w1 = jax.random.normal(k2, (3, 3, Cin, Cmid), jnp.float32) * 0.1   # HWIO
    b1 = jax.random.normal(k3, (Cmid,), jnp.float32) * 0.1
    w2 = jax.random.normal(k4, (3, 3, Cmid, Cout), jnp.float32) * 0.1
    b2 = jax.random.normal(k5, (Cout,), jnp.float32) * 0.1

    out = jax.block_until_ready(decoder_block_v2_forward(x, w1, b1, w2, b2))
    assert out.shape == (N, Cout, 2 * H, 2 * W), out.shape

    ref = jax.block_until_ready(_reference_forward(x, w1, b1, w2, b2))
    # Tolerance reflects the bf16 MXU operand path (accumulation is f32); an
    # all-f32 variant of this kernel matches the reference to ~1e-6.
    max_err = float(jnp.max(jnp.abs(out - ref)))
    assert jnp.allclose(out, ref, atol=3e-2, rtol=3e-2), max_err

    print("KERNEL_OK")
</pallas_src>

<mosaic_0001>
module attributes {stable_mosaic.version = 11 : i64} {
  func.func private @main(%arg0: i32) attributes {dimension_semantics = [#tpu.dimension_semantics<core_parallel>], iteration_bounds = array<i64: 2>, tpu.core_type = #tpu.core_type<sc_scalar_subcore>, window_params = []} {
    return
  }
}

module attributes {stable_mosaic.version = 11 : i64} {
  func.func private @main(%arg0: i32) attributes {dimension_semantics = [#tpu.dimension_semantics<core_parallel>], iteration_bounds = array<i64: 2>, tpu.core_type = #tpu.core_type<sc_scalar_subcore>, window_params = []} {
    return
  }
}

module attributes {stable_mosaic.version = 11 : i64} {
  func.func @kernel(%arg0: i32, %arg1: memref<1x4x1156xbf16, #tpu.memory_space<vmem>>, %arg2: memref<1x1280xf32, #tpu.memory_space<vmem>>, %arg3: memref<8x36xbf16, #tpu.memory_space<vmem>>, %arg4: memref<8x1xf32, #tpu.memory_space<vmem>>, %arg5: memref<4x72xbf16, #tpu.memory_space<vmem>>, %arg6: memref<4x1xf32, #tpu.memory_space<vmem>>, %arg7: memref<1x4x1280xf32, #tpu.memory_space<vmem>>, %arg8: memref<4x1536xbf16, #tpu.memory_space<vmem>>, %arg9: memref<8x1536xbf16, #tpu.memory_space<vmem>>, %arg10: memref<36x1280xbf16, #tpu.memory_space<vmem>>, %arg11: memref<72x1280xbf16, #tpu.memory_space<vmem>>) attributes {dimension_semantics = [#tpu.dimension_semantics<parallel>], iteration_bounds = array<i64: 2>, scalar_prefetch = 0 : i64, scratch_operands = 4 : i64, tpu.core_type = #tpu.core_type<tc>, window_params = [{transform_indices = @transform_0, window_bounds = array<i64: 1, 4, 1156>}, {pipeline_mode = #tpu.pipeline_mode<synchronous>, transform_indices = @transform_1, window_bounds = array<i64: 1, 1280>}, {pipeline_mode = #tpu.pipeline_mode<synchronous>, transform_indices = @transform_2, window_bounds = array<i64: 8, 36>}, {pipeline_mode = #tpu.pipeline_mode<synchronous>, transform_indices = @transform_3, window_bounds = array<i64: 8, 1>}, {pipeline_mode = #tpu.pipeline_mode<synchronous>, transform_indices = @transform_4, window_bounds = array<i64: 4, 72>}, {pipeline_mode = #tpu.pipeline_mode<synchronous>, transform_indices = @transform_5, window_bounds = array<i64: 4, 1>}, {transform_indices = @transform_6, window_bounds = array<i64: 1, 4, 1280>}]} {
    %cst = arith.constant 0.000000e+00 : bf16
    %0 = vector.broadcast %cst : bf16 to vector<4x128xbf16>
    %c0 = arith.constant 0 : index
    %c0_0 = arith.constant 0 : index
    %1 = vector.load %arg8[%c0, %c0_0] : memref<4x1536xbf16, #tpu.memory_space<vmem>>, vector<4x128xbf16>
    tpu.vector_store %arg8[%c0, %c0_0], %0 {strides = array<i32>} : memref<4x1536xbf16, #tpu.memory_space<vmem>>, vector<4x128xbf16>,
    %cst_1 = arith.constant 0.000000e+00 : bf16
    %2 = vector.broadcast %cst_1 : bf16 to vector<4x252xbf16>
    %c0_2 = arith.constant 0 : index
    %c1284 = arith.constant 1284 : index
    %3 = vector.load %arg8[%c0_2, %c1284] : memref<4x1536xbf16, #tpu.memory_space<vmem>>, vector<4x252xbf16>
    tpu.vector_store %arg8[%c0_2, %c1284], %2 {strides = array<i32>} : memref<4x1536xbf16, #tpu.memory_space<vmem>>, vector<4x252xbf16>,
    %c0_3 = arith.constant 0 : index
    %c0_4 = arith.constant 0 : index
    %c0_5 = arith.constant 0 : index
    %4 = vector.load %arg1[%c0_3, %c0_4, %c0_5] : memref<1x4x1156xbf16, #tpu.memory_space<vmem>>, vector<1x4x1156xbf16>
    %5 = vector.shape_cast %4 : vector<1x4x1156xbf16> to vector<4x1156xbf16>
    %c0_6 = arith.constant 0 : index
    %c128 = arith.constant 128 : index
    %6 = vector.load %arg8[%c0_6, %c128] : memref<4x1536xbf16, #tpu.memory_space<vmem>>, vector<4x1156xbf16>
    tpu.vector_store %arg8[%c0_6, %c128], %5 {strides = array<i32>} : memref<4x1536xbf16, #tpu.memory_space<vmem>>, vector<4x1156xbf16>,
    %cst_7 = arith.constant 0.000000e+00 : bf16
    %7 = vector.broadcast %cst_7 : bf16 to vector<8x128xbf16>
    %c0_8 = arith.constant 0 : index
    %c0_9 = arith.constant 0 : index
    %8 = vector.load %arg9[%c0_8, %c0_9] : memref<8x1536xbf16, #tpu.memory_space<vmem>>, vector<8x128xbf16>
    tpu.vector_store %arg9[%c0_8, %c0_9], %7 {strides = array<i32>} : memref<8x1536xbf16, #tpu.memory_space<vmem>>, vector<8x128xbf16>,
    %cst_10 = arith.constant 0.000000e+00 : bf16
    %9 = vector.broadcast %cst_10 : bf16 to vector<8x128xbf16>
    %c0_11 = arith.constant 0 : index
    %c1408 = arith.constant 1408 : index
    %10 = vector.load %arg9[%c0_11, %c1408] : memref<8x1536xbf16, #tpu.memory_space<vmem>>, vector<8x128xbf16>
    tpu.vector_store %arg9[%c0_11, %c1408], %9 {strides = array<i32>} : memref<8x1536xbf16, #tpu.memory_space<vmem>>, vector<8x128xbf16>,
    %c0_12 = arith.constant 0 : index
    %c93 = arith.constant 93 : index
    %11 = vector.load %arg8[%c0_12, %c93] : memref<4x1536xbf16, #tpu.memory_space<vmem>>, vector<4x1280xbf16>
    %c0_13 = arith.constant 0 : index
    %c0_14 = arith.constant 0 : index
    %12 = vector.load %arg10[%c0_13, %c0_14] : memref<36x1280xbf16, #tpu.memory_space<vmem>>, vector<4x1280xbf16>
    tpu.vector_store %arg10[%c0_13, %c0_14], %11 {strides = array<i32>} : memref<36x1280xbf16, #tpu.memory_space<vmem>>, vector<4x1280xbf16>,
    %c0_15 = arith.constant 0 : index
    %c94 = arith.constant 94 : index
    %13 = vector.load %arg8[%c0_15, %c94] : memref<4x1536xbf16, #tpu.memory_space<vmem>>, vector<4x1280xbf16>
    %c4 = arith.constant 4 : index
    %c0_16 = arith.constant 0 : index
    %14 = vector.load %arg10[%c4, %c0_16] : memref<36x1280xbf16, #tpu.memory_space<vmem>>, vector<4x1280xbf16>
    tpu.vector_store %arg10[%c4, %c0_16], %13 {strides = array<i32>} : memref<36x1280xbf16, #tpu.memory_space<vmem>>, vector<4x1280xbf16>,
    %c0_17 = arith.constant 0 : index
    %c95 = arith.constant 95 : index
    %15 = vector.load %arg8[%c0_17, %c95] : memref<4x1536xbf16, #tpu.memory_space<vmem>>, vector<4x1280xbf16>
    %c8 = arith.constant 8 : index
    %c0_18 = arith.constant 0 : index
    %16 = vector.load %arg10[%c8, %c0_18] : memref<36x1280xbf16, #tpu.memory_space<vmem>>, vector<4x1280xbf16>
    tpu.vector_store %arg10[%c8, %c0_18], %15 {strides = array<i32>} : memref<36x1280xbf16, #tpu.memory_space<vmem>>, vector<4x1280xbf16>,
    %c0_19 = arith.constant 0 : index
    %c127 = arith.constant 127 : index
    %17 = vector.load %arg8[%c0_19, %c127] : memref<4x1536xbf16, #tpu.memory_space<vmem>>, vector<4x1280xbf16>
    %c12 = arith.constant 12 : index
    %c0_20 = arith.constant 0 : index
    %18 = vector.load %arg10[%c12, %c0_20] : memref<36x1280xbf16, #tpu.memory_space<vmem>>, vector<4x1280xbf16>
    tpu.vector_store %arg10[%c12, %c0_20], %17 {strides = array<i32>} : memref<36x1280xbf16, #tpu.memory_space<vmem>>, vector<4x1280xbf16>,
    %c0_21 = arith.constant 0 : index
    %c128_22 = arith.constant 128 : index
    %19 = vector.load %arg8[%c0_21, %c128_22] : memref<4x1536xbf16, #tpu.memory_space<vmem>>, vector<4x1280xbf16>
    %c16 = arith.constant 16 : index
    %c0_23 = arith.constant 0 : index
    %20 = vector.load %arg10[%c16, %c0_23] : memref<36x1280xbf16, #tpu.memory_space<vmem>>, vector<4x1280xbf16>
    tpu.vector_store %arg10[%c16, %c0_23], %19 {strides = array<i32>} : memref<36x1280xbf16, #tpu.memory_space<vmem>>, vector<4x1280xbf16>,
    %c0_24 = arith.constant 0 : index
    %c129 = arith.constant 129 : index
    %21 = vector.load %arg8[%c0_24, %c129] : memref<4x1536xbf16, #tpu.memory_space<vmem>>, vector<4x1280xbf16>
    %c20 = arith.constant 20 : index
    %c0_25 = arith.constant 0 : index
    %22 = vector.load %arg10[%c20, %c0_25] : memref<36x1280xbf16, #tpu.memory_space<vmem>>, vector<4x1280xbf16>
    tpu.vector_store %arg10[%c20, %c0_25], %21 {strides = array<i32>} : memref<36x1280xbf16, #tpu.memory_space<vmem>>, vector<4x1280xbf16>,
    %c0_26 = arith.constant 0 : index
    %c161 = arith.constant 161 : index
    %23 = vector.load %arg8[%c0_26, %c161] : memref<4x1536xbf16, #tpu.memory_space<vmem>>, vector<4x1280xbf16>
    %c24 = arith.constant 24 : index
    %c0_27 = arith.constant 0 : index
    %24 = vector.load %arg10[%c24, %c0_27] : memref<36x1280xbf16, #tpu.memory_space<vmem>>, vector<4x1280xbf16>
    tpu.vector_store %arg10[%c24, %c0_27], %23 {strides = array<i32>} : memref<36x1280xbf16, #tpu.memory_space<vmem>>, vector<4x1280xbf16>,
    %c0_28 = arith.constant 0 : index
    %c162 = arith.constant 162 : index
    %25 = vector.load %arg8[%c0_28, %c162] : memref<4x1536xbf16, #tpu.memory_space<vmem>>, vector<4x1280xbf16>
    %c28 = arith.constant 28 : index
    %c0_29 = arith.constant 0 : index
    %26 = vector.load %arg10[%c28, %c0_29] : memref<36x1280xbf16, #tpu.memory_space<vmem>>, vector<4x1280xbf16>
    tpu.vector_store %arg10[%c28, %c0_29], %25 {strides = array<i32>} : memref<36x1280xbf16, #tpu.memory_space<vmem>>, vector<4x1280xbf16>,
    %c0_30 = arith.constant 0 : index
    %c163 = arith.constant 163 : index
    %27 = vector.load %arg8[%c0_30, %c163] : memref<4x1536xbf16, #tpu.memory_space<vmem>>, vector<4x1280xbf16>
    %c32 = arith.constant 32 : index
    %c0_31 = arith.constant 0 : index
    %28 = vector.load %arg10[%c32, %c0_31] : memref<36x1280xbf16, #tpu.memory_space<vmem>>, vector<4x1280xbf16>
    tpu.vector_store %arg10[%c32, %c0_31], %27 {strides = array<i32>} : memref<36x1280xbf16, #tpu.memory_space<vmem>>, vector<4x1280xbf16>,
    %c0_32 = arith.constant 0 : index
    %c0_33 = arith.constant 0 : index
    %29 = vector.load %arg3[%c0_32, %c0_33] : memref<8x36xbf16, #tpu.memory_space<vmem>>, vector<8x36xbf16>
    %c0_34 = arith.constant 0 : index
    %c0_35 = arith.constant 0 : index
    %30 = vector.load %arg10[%c0_34, %c0_35] : memref<36x1280xbf16, #tpu.memory_space<vmem>>, vector<36x1280xbf16>
    %cst_36 = arith.constant dense<0.000000e+00> : vector<8x1280xf32>
    %31 = tpu.matmul %29, %30, %cst_36 {dimension_numbers = #tpu.dot_dimension_numbers<[1], [0], [0], [1], [0, 0, 1, 1], [], []>} : vector<8x36xbf16>, vector<36x1280xbf16>, vector<8x1280xf32> -> vector<8x1280xf32>
    %c0_37 = arith.constant 0 : index
    %c0_38 = arith.constant 0 : index
    %32 = vector.load %arg4[%c0_37, %c0_38] : memref<8x1xf32, #tpu.memory_space<vmem>>, vector<8x1xf32>
    %33 = vector.broadcast %32 : vector<8x1xf32> to vector<8x1280xf32>
    %34 = arith.addf %31, %33 : vector<8x1280xf32>
    %cst_39 = arith.constant 0.000000e+00 : f32
    %35 = vector.broadcast %cst_39 : f32 to vector<8x1280xf32>
    %36 = arith.maximumf %34, %35 : vector<8x1280xf32>
    %c0_40 = arith.constant 0 : index
    %c0_41 = arith.constant 0 : index
    %37 = vector.load %arg2[%c0_40, %c0_41] : memref<1x1280xf32, #tpu.memory_space<vmem>>, vector<1x1280xf32>
    %38 = vector.broadcast %37 : vector<1x1280xf32> to vector<8x1280xf32>
    %39 = arith.mulf %36, %38 : vector<8x1280xf32>
    %40 = arith.truncf %39 : vector<8x1280xf32> to vector<8x1280xbf16>
    %c0_42 = arith.constant 0 : index
    %c128_43 = arith.constant 128 : index
    %41 = vector.load %arg9[%c0_42, %c128_43] : memref<8x1536xbf16, #tpu.memory_space<vmem>>, vector<8x1280xbf16>
    tpu.vector_store %arg9[%c0_42, %c128_43], %40 {strides = array<i32>} : memref<8x1536xbf16, #tpu.memory_space<vmem>>, vector<8x1280xbf16>,
    %c0_44 = arith.constant 0 : index
    %c93_45 = arith.constant 93 : index
    %42 = vector.load %arg9[%c0_44, %c93_45] : memref<8x1536xbf16, #tpu.memory_space<vmem>>, vector<8x1280xbf16>
    %c0_46 = arith.constant 0 : index
    %c0_47 = arith.constant 0 : index
    %43 = vector.load %arg11[%c0_46, %c0_47] : memref<72x1280xbf16, #tpu.memory_space<vmem>>, vector<8x1280xbf16>
    tpu.vector_store %arg11[%c0_46, %c0_47], %42 {strides = array<i32>} : memref<72x1280xbf16, #tpu.memory_space<vmem>>, vector<8x1280xbf16>,
    %c0_48 = arith.constant 0 : index
    %c94_49 = arith.constant 94 : index
    %44 = vector.load %arg9[%c0_48, %c94_49] : memref<8x1536xbf16, #tpu.memory_space<vmem>>, vector<8x1280xbf16>
    %c8_50 = arith.constant 8 : index
    %c0_51 = arith.constant 0 : index
    %45 = vector.load %arg11[%c8_50, %c0_51] : memref<72x1280xbf16, #tpu.memory_space<vmem>>, vector<8x1280xbf16>
    tpu.vector_store %arg11[%c8_50, %c0_51], %44 {strides = array<i32>} : memref<72x1280xbf16, #tpu.memory_space<vmem>>, vector<8x1280xbf16>,
    %c0_52 = arith.constant 0 : index
    %c95_53 = arith.constant 95 : index
    %46 = vector.load %arg9[%c0_52, %c95_53] : memref<8x1536xbf16, #tpu.memory_space<vmem>>, vector<8x1280xbf16>
    %c16_54 = arith.constant 16 : index
    %c0_55 = arith.constant 0 : index
    %47 = vector.load %arg11[%c16_54, %c0_55] : memref<72x1280xbf16, #tpu.memory_space<vmem>>, vector<8x1280xbf16>
    tpu.vector_store %arg11[%c16_54, %c0_55], %46 {strides = array<i32>} : memref<72x1280xbf16, #tpu.memory_space<vmem>>, vector<8x1280xbf16>,
    %c0_56 = arith.constant 0 : index
    %c127_57 = arith.constant 127 : index
    %48 = vector.load %arg9[%c0_56, %c127_57] : memref<8x1536xbf16, #tpu.memory_space<vmem>>, vector<8x1280xbf16>
    %c24_58 = arith.constant 24 : index
    %c0_59 = arith.constant 0 : index
    %49 = vector.load %arg11[%c24_58, %c0_59] : memref<72x1280xbf16, #tpu.memory_space<vmem>>, vector<8x1280xbf16>
    tpu.vector_store %arg11[%c24_58, %c0_59], %48 {strides = array<i32>} : memref<72x1280xbf16, #tpu.memory_space<vmem>>, vector<8x1280xbf16>,
    %c0_60 = arith.constant 0 : index
    %c128_61 = arith.constant 128 : index
    %50 = vector.load %arg9[%c0_60, %c128_61] : memref<8x1536xbf16, #tpu.memory_space<vmem>>, vector<8x1280xbf16>
    %c32_62 = arith.constant 32 : index
    %c0_63 = arith.constant 0 : index
    %51 = vector.load %arg11[%c32_62, %c0_63] : memref<72x1280xbf16, #tpu.memory_space<vmem>>, vector<8x1280xbf16>
    tpu.vector_store %arg11[%c32_62, %c0_63], %50 {strides = array<i32>} : memref<72x1280xbf16, #tpu.memory_space<vmem>>, vector<8x1280xbf16>,
    %c0_64 = arith.constant 0 : index
    %c129_65 = arith.constant 129 : index
    %52 = vector.load %arg9[%c0_64, %c129_65] : memref<8x1536xbf16, #tpu.memory_space<vmem>>, vector<8x1280xbf16>
    %c40 = arith.constant 40 : index
    %c0_66 = arith.constant 0 : index
    %53 = vector.load %arg11[%c40, %c0_66] : memref<72x1280xbf16, #tpu.memory_space<vmem>>, vector<8x1280xbf16>
    tpu.vector_store %arg11[%c40, %c0_66], %52 {strides = array<i32>} : memref<72x1280xbf16, #tpu.memory_space<vmem>>, vector<8x1280xbf16>,
    %c0_67 = arith.constant 0 : index
    %c161_68 = arith.constant 161 : index
    %54 = vector.load %arg9[%c0_67, %c161_68] : memref<8x1536xbf16, #tpu.memory_space<vmem>>, vector<8x1280xbf16>
    %c48 = arith.constant 48 : index
    %c0_69 = arith.constant 0 : index
    %55 = vector.load %arg11[%c48, %c0_69] : memref<72x1280xbf16, #tpu.memory_space<vmem>>, vector<8x1280xbf16>
    tpu.vector_store %arg11[%c48, %c0_69], %54 {strides = array<i32>} : memref<72x1280xbf16, #tpu.memory_space<vmem>>, vector<8x1280xbf16>,
    %c0_70 = arith.constant 0 : index
    %c162_71 = arith.constant 162 : index
    %56 = vector.load %arg9[%c0_70, %c162_71] : memref<8x1536xbf16, #tpu.memory_space<vmem>>, vector<8x1280xbf16>
    %c56 = arith.constant 56 : index
    %c0_72 = arith.constant 0 : index
    %57 = vector.load %arg11[%c56, %c0_72] : memref<72x1280xbf16, #tpu.memory_space<vmem>>, vector<8x1280xbf16>
    tpu.vector_store %arg11[%c56, %c0_72], %56 {strides = array<i32>} : memref<72x1280xbf16, #tpu.memory_space<vmem>>, vector<8x1280xbf16>,
    %c0_73 = arith.constant 0 : index
    %c163_74 = arith.constant 163 : index
    %58 = vector.load %arg9[%c0_73, %c163_74] : memref<8x1536xbf16, #tpu.memory_space<vmem>>, vector<8x1280xbf16>
    %c64 = arith.constant 64 : index
    %c0_75 = arith.constant 0 : index
    %59 = vector.load %arg11[%c64, %c0_75] : memref<72x1280xbf16, #tpu.memory_space<vmem>>, vector<8x1280xbf16>
    tpu.vector_store %arg11[%c64, %c0_75], %58 {strides = array<i32>} : memref<72x1280xbf16, #tpu.memory_space<vmem>>, vector<8x1280xbf16>,
    %c0_76 = arith.constant 0 : index
    %c0_77 = arith.constant 0 : index
    %60 = vector.load %arg5[%c0_76, %c0_77] : memref<4x72xbf16, #tpu.memory_space<vmem>>, vector<4x72xbf16>
    %c0_78 = arith.constant 0 : index
    %c0_79 = arith.constant 0 : index
    %61 = vector.load %arg11[%c0_78, %c0_79] : memref<72x1280xbf16, #tpu.memory_space<vmem>>, vector<72x1280xbf16>
    %cst_80 = arith.constant dense<0.000000e+00> : vector<4x1280xf32>
    %62 = tpu.matmul %60, %61, %cst_80 {dimension_numbers = #tpu.dot_dimension_numbers<[1], [0], [0], [1], [0, 0, 1, 1], [], []>} : vector<4x72xbf16>, vector<72x1280xbf16>, vector<4x1280xf32> -> vector<4x1280xf32>
    %c0_81 = arith.constant 0 : index
    %c0_82 = arith.constant 0 : index
    %63 = vector.load %arg6[%c0_81, %c0_82] : memref<4x1xf32, #tpu.memory_space<vmem>>, vector<4x1xf32>
    %64 = vector.broadcast %63 : vector<4x1xf32> to vector<4x1280xf32>
    %65 = arith.addf %62, %64 : vector<4x1280xf32>
    %cst_83 = arith.constant 0.000000e+00 : f32
    %66 = vector.broadcast %cst_83 : f32 to vector<4x1280xf32>
    %67 = arith.maximumf %65, %66 : vector<4x1280xf32>
    %c0_84 = arith.constant 0 : index
    %c0_85 = arith.constant 0 : index
    %c0_86 = arith.constant 0 : index
    %68 = vector.load %arg7[%c0_84, %c0_85, %c0_86] : memref<1x4x1280xf32, #tpu.memory_space<vmem>>, vector<1x4x1280xf32>
    %69 = vector.shape_cast %68 : vector<1x4x1280xf32> to vector<4x1280xf32>
    %70 = vector.shape_cast %67 : vector<4x1280xf32> to vector<1x4x1280xf32>
    tpu.vector_store %arg7[%c0_84, %c0_85, %c0_86], %70 {strides = array<i32>} : memref<1x4x1280xf32, #tpu.memory_space<vmem>>, vector<1x4x1280xf32>,
    return
  }
  func.func @transform_0(%arg0: i32) -> (i32, i32, i32) {
    %c0_i32 = arith.constant 0 : i32
    %c0_i32_0 = arith.constant 0 : i32
    %c0_i32_1 = arith.constant 0 : i32
    return %arg0, %c0_i32, %c0_i32_0 : i32, i32, i32
  }
  func.func @transform_1(%arg0: i32) -> (i32, i32) {
    %c0_i32 = arith.constant 0 : i32
    %c0_i32_0 = arith.constant 0 : i32
    %c0_i32_1 = arith.constant 0 : i32
    return %c0_i32, %c0_i32_0 : i32, i32
  }
  func.func @transform_2(%arg0: i32) -> (i32, i32) {
    %c0_i32 = arith.constant 0 : i32
    %c0_i32_0 = arith.constant 0 : i32
    %c0_i32_1 = arith.constant 0 : i32
    return %c0_i32, %c0_i32_0 : i32, i32
  }
  func.func @transform_3(%arg0: i32) -> (i32, i32) {
    %c0_i32 = arith.constant 0 : i32
    %c0_i32_0 = arith.constant 0 : i32
    %c0_i32_1 = arith.constant 0 : i32
    return %c0_i32, %c0_i32_0 : i32, i32
  }
  func.func @transform_4(%arg0: i32) -> (i32, i32) {
    %c0_i32 = arith.constant 0 : i32
    %c0_i32_0 = arith.constant 0 : i32
    %c0_i32_1 = arith.constant 0 : i32
    return %c0_i32, %c0_i32_0 : i32, i32
  }
  func.func @transform_5(%arg0: i32) -> (i32, i32) {
    %c0_i32 = arith.constant 0 : i32
    %c0_i32_0 = arith.constant 0 : i32
    %c0_i32_1 = arith.constant 0 : i32
    return %c0_i32, %c0_i32_0 : i32, i32
  }
  func.func @transform_6(%arg0: i32) -> (i32, i32, i32) {
    %c0_i32 = arith.constant 0 : i32
    %c0_i32_0 = arith.constant 0 : i32
    %c0_i32_1 = arith.constant 0 : i32
    return %arg0, %c0_i32, %c0_i32_0 : i32, i32, i32
  }
}

</mosaic_0001>

<bundles_post_ra>
// kernel: decoder_block_v2_forward.1
= control target key start
LH: loop header
LB: loop body
LE: loop exit
PB: predicated region body
PF: predicated region fallthrough
CT: control target
= control target key end

     0   :  { %s2828_s21 = smov 0   ;;  %s3561_s0 = inlined_call_operand.vmem [shape: bf16[2,4,1156], index: 0, kind: input, shape index: {}]   ;;  %s3562_s1 = inlined_call_operand.vmem [shape: f32[1,1280], index: 1, kind: input, shape index: {}]   ;;  %s3563_s2 = inlined_call_operand.vmem [shape: bf16[8,36], index: 2, kind: input, shape index: {}]   ;;  %s3564_s3 = inlined_call_operand.vmem [shape: f32[8,1], index: 3, kind: input, shape index: {}]   ;;  %s3565_s4 = inlined_call_operand.vmem [shape: bf16[4,72], index: 4, kind: input, shape index: {}]   ;;  %s3566_s5 = inlined_call_operand.vmem [shape: f32[4,1], index: 5, kind: input, shape index: {}]   ;;  %s3567_s6 = inlined_call_operand.vmem [shape: f32[2,4,1280], index: 6, kind: output, shape index: {}]  }
   0x1 LB: > { %s2575_s22 = sadd.s32 4294967295, %s2781_s21   ;;  %p2579_p0 = scmp.ge.s32.totalorder %s2781_s21, 1  ;;  %s2781_s21 = sphi %s2828_s21, %s16_s21  }
   0x2   : > { %p212_p1 = scmp.lt.s32.totalorder %s2781_s21, 3 }
   0x4   : > { %p213_p2 = pnand %p2579_p0, %p212_p1 }
   0x5   : > { %p242_p3 = scmp.lt.s32.totalorder (!%p213_p2), %s2575_s22, 1  ;;  %vm254_vm0 = vcmask (!%p213_p2), 1041440   ;;  %v2783_v0 = vmov (!%p213_p2), 1983009808   ;;  %v279_v2 = vlaneseq (!%p213_p2)  ;;  %v2784_v3 = vmov (!%p213_p2), 0   ;;  %s2785_s27 = smov (!%p213_p2), 35  }
   0x6   : > { %216 = sbr.rel (%p213_p2) target bundleno = 873 (0x369), region = 44  ;;  %v277_v1 = vunpack.c.l.s4 (!%p213_p2), %v2783_v0  ;;  %253 = vst [vmem:[#allocation2] sm:$0x3] (!%p213_p2), %v2784_v3  ;;  %267 = vst [vmem:[#allocation3] sm:$0xf] (!%p213_p2), %v2784_v3  ;;  %vm255_vm1 = vcmask (!%p213_p2), 1043458   ;;  %1266 = vmatprep.mubr.bf16.mxu0 (!%p213_p2), %v2784_v3  ;;  %1307 = vmatprep.mubr.bf16.mxu1 (!%p213_p2), %v2784_v3 }
   0x7   : > { %268 = vst [vmem:[#allocation3 + $0x2c] sm:$0xf] (!%p213_p2), %v2784_v3  ;;  %vm256_vm2 = vmor (!%p213_p2), %vm255_vm1, %vm254_vm0  ;;  %vm263_vm3 = vcmask (!%p213_p2), 1041408   ;;  %vm264_vm4 = vcmask (!%p213_p2), 27650   ;;  %2719 = vset.pattern.permute.xlu0 (!%p213_p2), %v2784_v3  ;;  %v2846_v5 = vshrl.u32 (!%p213_p2), %v279_v2, 7  ;;  %s2786_s28 = smov (!%p213_p2), 34  }
   0x8   : > { %257 = vst.msk [vmem:[#allocation2 + $0x14] sm:$0xf] (!%p213_p2), %vm256_vm2, %v2784_v3  ;;  %v278_v4 = vunpack.c.0.s8 (!%p213_p2), %v277_v1  ;;  %vm265_vm5 = vmor (!%p213_p2), %vm264_vm4, %vm263_vm3  ;;  %s2787_s29 = smov (!%p213_p2), 33   ;;  %s2788_s30 = smov (!%p213_p2), 1   ;;  %v1069_v1 = vld [vmem:[%s3564_s3] sm:$0xff] (!%p213_p2)  ;;  %vm338_vm6 = vcmask (!%p213_p2), 1043456  }
   0x9   : > { %s2789_s7 = smov (!%p213_p2), 127   ;;  %s2790_s8 = smov (!%p213_p2), 95   ;;  %vm430_vm7 = vcmask (!%p213_p2), 277504   ;;  %vm520_vm8 = vcmask (!%p213_p2), 269312   ;;  %vm610_vm9 = vcmask (!%p213_p2), 7168   ;;  %vm340_vm10 = vcmask (!%p213_p2), 285696  }
   0xa   : > { %v2853_v9 = vsub.s32 (!%p213_p2), %v278_v4, %v2846_v5  ;;  %s2791_s9 = smov (!%p213_p2), 94   ;;  %s2792_s10 = smov (!%p213_p2), 93   ;;  %vm753_vm11 = vcmask (!%p213_p2), 1039360   ;;  %vm843_vm12 = vcmask (!%p213_p2), 777216   ;;  %vm933_vm13 = vcmask (!%p213_p2), 769024  }
   0xb   : > { %vm1023_vm14 = vcmask (!%p213_p2), 760832   ;;  %vm1200_vm15 = vcmask (!%p213_p2), 293888   ;;  %vm2245_vm0 = vcmask (!%p213_p2), 588800  }
   0xd   : > { %s3569_s22 = smov (!%p242_p3, %s2575_s22), 1 }
   0xe   : > { %s2699_s23 = smul.u32 20, %s3569_s22 }
   0xf   : > { %s2700_s25 = smul.u32 40, %s3569_s22 }
  0x10   : > { %s246_s26 = scalar_lea.vmem %s3561_s0, %s2699_s23 }
  0x11   : > { %v258_v6 = vld [vmem:[%s246_s26] sm:$0xff]  ;;  %v259_v7 = vld [vmem:[%s246_s26 + $0x8] sm:$0xff]  ;;  %v260_v8 = vld [vmem:[%s246_s26 + $0x10] sm:$0xf] }
  0x12   : > { %261 = vst [vmem:[#allocation2 + $0x2] sm:$0xff] %v258_v6  ;;  %262 = vst [vmem:[#allocation2 + $0xa] sm:$0xff] %v259_v7  ;;  %v779_v10 = vcombine.high %v258_v6, %v258_v6  ;;  %v794_v11 = vcombine.high %v259_v7, %v259_v7  ;;  %v689_v23 = vcombine.low %v258_v6, %v258_v6 }
  0x13   : > { %266 = vst.msk [vmem:[#allocation2 + $0x12] sm:$0xf] %vm265_vm5, %v260_v8  ;;  %2583 = vst.sshfl [vmem:[#allocation4 + $0x50] sm:$0xf pattern:$0x76325410] %v258_v6  ;;  %v703_v24 = vrot.slane %v258_v6, %v2853_v9  ;;  %v704_v26 = vcombine.low %v259_v7, %v259_v7  ;;  %v801_v28 = vrot.slane %v259_v7, %v2853_v9 }
  0x14   : > { %2585 = vst.sshfl [vmem:[#allocation4 + $0x60] sm:$0xf pattern:$0x76325410] %v259_v7  ;;  %v2856_v12 = vrot.slane %v794_v11, %v2853_v9  ;;  %v696_v25 = vrot.slane %v689_v23, %v2853_v9  ;;  %v793_v29 = vrot.slane %v779_v10, %v2853_v9 }
  0x15   : > { %2584 = vst.sshfl [vmem:[#allocation4 + $0x58] sm:$0xf pattern:$0x76325410] %v779_v10  ;;  %v711_v27 = vrot.slane %v704_v26, %v2853_v9 }
  0x16   : > { %2586 = vst.sshfl [vmem:[#allocation4 + $0x68] sm:$0xf pattern:$0x76325410] %v794_v11 }
  0x19   : > { %v270_v13 = vld [vmem:[#allocation2 + $0x8] sm:$0xff]  ;;  %v269_v14 = vld [vmem:[#allocation2] sm:$0xff] }
  0x1a   : > { %v2859_v15 = vrot.slane %v270_v13, %v2853_v9  ;;  %v282_v16 = vrot.slane %v269_v14, %v2853_v9  ;;  %v366_v17 = vcombine.low %v269_v14, %v269_v14  ;;  %v381_v18 = vcombine.low %v270_v13, %v270_v13  ;;  %v271_v31 = vld [vmem:[#allocation2 + $0x10] sm:$0x3f] }
  0x1b   : > { %v275_v20 = vcombine.high %v269_v14, %v269_v14  ;;  %v290_v30 = vcombine.high %v270_v13, %v270_v13  ;;  %v362_v32 = vld [vmem:[#allocation2 + $0x10] sm:$0x3f]  ;;  %v312_v33 = vrot.slane %v271_v31, %v2853_v9  ;;  %v305_v52 = vcombine.high %v271_v31, %v271_v31 }
  0x1c   : > { %324 = vrot.lane.b32.xlu1 %v2859_v15, %s2785_s27  ;;  %320 = vrot.lane.b32.xlu0 %v282_v16, %s2785_s27  ;;  %v373_v19 = vrot.slane %v366_v17, %v2853_v9  ;;  %v388_v21 = vrot.slane %v381_v18, %v2853_v9  ;;  %v396_v35 = vcombine.low %v362_v32, %v362_v32  ;;  %v452_v37 = vld [vmem:[#allocation2 + $0x10] sm:$0x3f] }
  0x1d   : > { %v470_v22 = vrot.slane %v275_v20, %v2853_v9  ;;  %v304_v34 = vrot.slane %v290_v30, %v2853_v9  ;;  %v542_v38 = vld [vmem:[#allocation2 + $0x10] sm:$0x3f]  ;;  %v493_v39 = vrot.slane %v452_v37, %v2853_v9  ;;  %v410_v53 = vrot.slane %v362_v32, %v2853_v9 }
  0x1e   : > { %v403_v36 = vrot.slane %v396_v35, %v2853_v9  ;;  %v576_v40 = vcombine.low %v542_v38, %v542_v38  ;;  %v685_v41 = vld [vmem:[#allocation2 + $0x12] sm:$0x3f]  ;;  %v319_v54 = vrot.slane %v305_v52, %v2853_v9  ;;  %v486_v55 = vcombine.high %v452_v37, %v452_v37 }
  0x1f   : > { %v719_v43 = vcombine.low %v685_v41, %v685_v41  ;;  %v775_v45 = vld [vmem:[#allocation2 + $0x12] sm:$0x3f]  ;;  %v590_v56 = vrot.slane %v542_v38, %v2853_v9  ;;  %v733_v61 = vrot.slane %v685_v41, %v2853_v9 }
  0x20   : > { %411 = vrot.lane.b32.xlu1 %v373_v19, %s2786_s28  ;;  %413 = vrot.lane.b32.xlu0 %v282_v16, %s2786_s28  ;;  %v583_v42 = vrot.slane %v576_v40, %v2853_v9  ;;  %v865_v46 = vld [vmem:[#allocation2 + $0x12] sm:$0x3f]  ;;  %v816_v47 = vrot.slane %v775_v45, %v2853_v9  ;;  %v500_v57 = vrot.slane %v486_v55, %v2853_v9 }
  0x21   : > { %v726_v44 = vrot.slane %v719_v43, %v2853_v9  ;;  %v899_v48 = vcombine.low %v865_v46, %v865_v46  ;;  %v955_v50 = vld [vmem:[#allocation2 + $0x12] sm:$0x3f]  ;;  %v809_v58 = vcombine.high %v775_v45, %v775_v45  ;;  %v913_v0 = vrot.slane %v865_v46, %v2853_v9 }
  0x22   : > { %v996_v51 = vrot.slane %v955_v50, %v2853_v9  ;;  %v2582_v59 = vld.sshfl [vmem:[#allocation2 + $0x12] sm:$0x33 pattern:$0x76325410]  ;;  %v989_v62 = vcombine.high %v955_v50, %v955_v50 }
  0x23   : > { %v906_v49 = vrot.slane %v899_v48, %v2853_v9  ;;  %682 = vst [vmem:[#allocation4 + $0x70] sm:$0x33] %v2582_v59  ;;  %v823_v60 = vrot.slane %v809_v58, %v2853_v9 }
  0x24   : > { %415 = vrot.lane.b32.xlu1 %v388_v21, %s2786_s28  ;;  %501 = vrot.lane.b32.xlu0 %v282_v16, %s2787_s29  ;;  %v1003_v63 = vrot.slane %v989_v62, %v2853_v9 }
  0x28   : > { %503 = vrot.lane.b32.xlu1 %v470_v22, %s2787_s29  ;;  %505 = vrot.lane.b32.xlu0 %v2859_v15, %s2787_s29 }
  0x2c   : > { %591 = vrot.lane.b32.xlu1 %v373_v19, %s2788_s30  ;;  %593 = vrot.lane.b32.xlu0 %v282_v16, %s2788_s30 }
  0x30   : > { %595 = vrot.lane.b32.xlu1 %v388_v21, %s2788_s30  ;;  %322 = vrot.lane.b32.xlu0 %v470_v22, %s2785_s27 }
  0x34   : > { %736 = vrot.lane.b32.xlu1 %v703_v24, %s2789_s7  ;;  %734 = vrot.lane.b32.xlu0 %v696_v25, %s2789_s7 }
  0x38   : > { %824 = vrot.lane.b32.xlu1 %v703_v24, %s2790_s8  ;;  %738 = vrot.lane.b32.xlu0 %v711_v27, %s2789_s7 }
  0x3c   : > { %828 = vrot.lane.b32.xlu1 %v801_v28, %s2790_s8  ;;  %826 = vrot.lane.b32.xlu0 %v793_v29, %s2790_s8 }
  0x40   : > { %916 = vrot.lane.b32.xlu1 %v703_v24, %s2791_s9  ;;  %914 = vrot.lane.b32.xlu0 %v696_v25, %s2791_s9 }
  0x44   : > { %1004 = vrot.lane.b32.xlu1 %v703_v24, %s2792_s10  ;;  %918 = vrot.lane.b32.xlu0 %v711_v27, %s2791_s9 }
  0x48   : > { %1008 = vrot.lane.b32.xlu1 %v801_v28, %s2792_s10  ;;  %1006 = vrot.lane.b32.xlu0 %v793_v29, %s2792_s10 }
  0x4c   : > { %328 = vrot.lane.b32.xlu1 %v312_v33, %s2785_s27  ;;  %326 = vrot.lane.b32.xlu0 %v304_v34, %s2785_s27 }
  0x50   : > { %419 = vrot.lane.b32.xlu1 %v403_v36, %s2786_s28  ;;  %417 = vrot.lane.b32.xlu0 %v2859_v15, %s2786_s28 }
  0x54   : > { %509 = vrot.lane.b32.xlu1 %v493_v39, %s2787_s29  ;;  %507 = vrot.lane.b32.xlu0 %v304_v34, %s2787_s29 }
  0x58   : > { %599 = vrot.lane.b32.xlu1 %v583_v42, %s2788_s30  ;;  %597 = vrot.lane.b32.xlu0 %v2859_v15, %s2788_s30 }
  0x5c   : > { %742 = vrot.lane.b32.xlu1 %v726_v44, %s2789_s7  ;;  %740 = vrot.lane.b32.xlu0 %v801_v28, %s2789_s7 }
  0x60   : > { %832 = vrot.lane.b32.xlu1 %v816_v47, %s2790_s8  ;;  %830 = vrot.lane.b32.xlu0 %v2856_v12, %s2790_s8 }
  0x64   : > { %922 = vrot.lane.b32.xlu1 %v906_v49, %s2791_s9  ;;  %920 = vrot.lane.b32.xlu0 %v801_v28, %s2791_s9 }
  0x68   : > { %1012 = vrot.lane.b32.xlu1 %v996_v51, %s2792_s10  ;;  %1010 = vrot.lane.b32.xlu0 %v2856_v12, %s2792_s10 }
  0x6c   : > { %421 = vrot.lane.b32.xlu1 %v410_v53, %s2786_s28  ;;  %330 = vrot.lane.b32.xlu0 %v319_v54, %s2785_s27 }
  0x70   : > { %601 = vrot.lane.b32.xlu1 %v590_v56, %s2788_s30  ;;  %511 = vrot.lane.b32.xlu0 %v500_v57, %s2787_s29 }
  0x74   : > { %834 = vrot.lane.b32.xlu1 %v823_v60, %s2790_s8  ;;  %744 = vrot.lane.b32.xlu0 %v733_v61, %s2789_s7 }
  0x78   : > { %1014 = vrot.lane.b32.xlu1 %v1003_v63, %s2792_s10  ;;  %924 = vrot.lane.b32.xlu0 %v913_v0, %s2791_s9 }
  0x7c   : > { %1072 = vperm.xlu0 %2719, %v1069_v1  }
  0x8e   : > { %v2944_v2 = vpop.permute.xlu1 %324  ;;  %v321_v4 = vpop.permute.xlu0 %320 }
  0x8f   : > { %v334_v34 = vrot.slane %v2944_v2, 4  ;;  %v332_v35 = vrot.slane %v321_v4, 4 }
  0x92   : > { %v412_v6 = vpop.permute.xlu1 %411  ;;  %v414_v7 = vpop.permute.xlu0 %413 }
  0x93   : > { %v423_v8 = vrot.slane %v412_v6, 4  ;;  %v424_v10 = vrot.slane %v414_v7, 4 }
  0x95   : > { %v429_v9 = vsel %vm338_vm6, %v423_v8, %v424_v10 }
  0x96   : > { %v431_v11 = vsel %vm430_vm7, %v412_v6, %v429_v9  ;;  %v2948_v12 = vpop.permute.xlu1 %415  ;;  %v502_v13 = vpop.permute.xlu0 %501 }
  0x97   : > { %445 = vst [vmem:[#allocation4] sm:$0xcc] %v431_v11  ;;  %v425_v14 = vrot.slane %v2948_v12, 4  ;;  %v513_v19 = vrot.slane %v502_v13, 4 }
  0x99   : > { %v432_v15 = vsel %vm338_vm6, %v424_v10, %v425_v14 }
  0x9a   : > { %v433_v16 = vsel %vm430_vm7, %v414_v7, %v432_v15  ;;  %v504_v17 = vpop.permute.xlu1 %503  ;;  %v2955_v18 = vpop.permute.xlu0 %505 }
  0x9b   : > { %446 = vst [vmem:[#allocation4 + $0x8] sm:$0xcc] %v433_v16  ;;  %v514_v20 = vrot.slane %v504_v17, 4  ;;  %v515_v21 = vrot.slane %v2955_v18, 4 }
  0x9d   : > { %v519_v22 = vsel %vm338_vm6, %v513_v19, %v514_v20  ;;  %v522_v23 = vsel %vm338_vm6, %v514_v20, %v515_v21 }
  0x9e   : > { %v521_v24 = vsel %vm520_vm8, %v502_v13, %v519_v22  ;;  %v523_v25 = vsel %vm520_vm8, %v504_v17, %v522_v23  ;;  %v592_v26 = vpop.permute.xlu1 %591  ;;  %v594_v27 = vpop.permute.xlu0 %593 }
  0x9f   : > { %535 = vst [vmem:[#allocation4 + $0x28] sm:$0x33] %v521_v24  ;;  %536 = vst [vmem:[#allocation4 + $0x30] sm:$0x33] %v523_v25  ;;  %v603_v28 = vrot.slane %v592_v26, 4  ;;  %v604_v29 = vrot.slane %v594_v27, 4 }
  0xa1   : > { %v609_v30 = vsel %vm338_vm6, %v603_v28, %v604_v29 }
  0xa2   : > { %v611_v31 = vsel %vm610_vm9, %v592_v26, %v609_v30  ;;  %v2966_v32 = vpop.permute.xlu1 %595  ;;  %v323_v33 = vpop.permute.xlu0 %322 }
  0xa3   : > { %625 = vst [vmem:[#allocation4 + $0x28] sm:$0xcc] %v611_v31  ;;  %v605_v36 = vrot.slane %v2966_v32, 4  ;;  %v333_v37 = vrot.slane %v323_v33, 4 }
  0xa5   : > { %v612_v38 = vsel %vm338_vm6, %v604_v29, %v605_v36  ;;  %v339_v39 = vsel %vm338_vm6, %v332_v35, %v333_v37  ;;  %v342_v40 = vsel %vm338_vm6, %v333_v37, %v334_v34 }
  0xa6   : > { %v613_v41 = vsel %vm610_vm9, %v594_v27, %v612_v38  ;;  %v341_v42 = vsel %vm340_vm10, %v321_v4, %v339_v39  ;;  %v343_v43 = vsel %vm340_vm10, %v323_v33, %v342_v40  ;;  %v737_v44 = vpop.permute.xlu1 %736  ;;  %v735_v45 = vpop.permute.xlu0 %734 }
  0xa7   : > { %626 = vst [vmem:[#allocation4 + $0x30] sm:$0xcc] %v613_v41  ;;  %355 = vst [vmem:[#allocation4] sm:$0x33] %v341_v42  ;;  %v747_v46 = vrot.slane %v737_v44, 4  ;;  %v746_v47 = vrot.slane %v735_v45, 4 }
  0xa8   : > { %356 = vst [vmem:[#allocation4 + $0x8] sm:$0x33] %v343_v43 }
  0xa9   : > { %v752_v48 = vsel %vm338_vm6, %v746_v47, %v747_v46 }
  0xaa   : > { %v754_v49 = vsel %vm753_vm11, %v735_v45, %v752_v48  ;;  %v825_v50 = vpop.permute.xlu1 %824  ;;  %v2982_v51 = vpop.permute.xlu0 %738 }
  0xab   : > { %768 = vst [vmem:[#allocation4 + $0x50] sm:$0xcc] %v754_v49  ;;  %v748_v52 = vrot.slane %v2982_v51, 4  ;;  %v836_v53 = vrot.slane %v825_v50, 4 }
  0xad   : > { %v755_v54 = vsel %vm338_vm6, %v747_v46, %v748_v52 }
  0xae   : > { %v756_v55 = vsel %vm753_vm11, %v737_v44, %v755_v54  ;;  %v2989_v56 = vpop.permute.xlu1 %828  ;;  %v827_v57 = vpop.permute.xlu0 %826  ;;  %v2735_v58 = vld [vmem:[#allocation4 + $0x4] ss:$40 sps:$4 sm:$0xff]   ;;  %v2739_v62 = vld [vmem:[#allocation4] ss:$40 sps:$4 sm:$0xff]  }
  0xaf   : > { %769 = vst [vmem:[#allocation4 + $0x58] sm:$0xcc] %v756_v55  ;;  %v838_v59 = vrot.slane %v2989_v56, 4  ;;  %v837_v60 = vrot.slane %v827_v57, 4  ;;  %v2737_v61 = vld [vmem:[#allocation4 + $0xc] ss:$40 sps:$4 sm:$0xff]   ;;  %1234 = vmatprep.subr.bf16.mxu0 %v2735_v58 }
  0xb0   : > { %v2740_v63 = vld [vmem:[#allocation4 + $0x8] ss:$40 sps:$4 sm:$0xff]   ;;  %1275 = vmatprep.subr.bf16.mxu1 %v2737_v61  ;;  %1235 = vmatpush1.bf16.msra.mxu0 %v2739_v62 }
  0xb1   : > { %v842_v0 = vsel %vm338_vm6, %v836_v53, %v837_v60  ;;  %v845_v1 = vsel %vm338_vm6, %v837_v60, %v838_v59  ;;  %1276 = vmatpush1.bf16.msra.mxu1 %v2740_v63 }
  0xb2   : > { %v844_v4 = vsel %vm843_vm12, %v825_v50, %v842_v0  ;;  %v846_v6 = vsel %vm843_vm12, %v827_v57, %v845_v1  ;;  %v917_v7 = vpop.permute.xlu1 %916  ;;  %v915_v8 = vpop.permute.xlu0 %914 }
  0xb3   : > { %858 = vst [vmem:[#allocation4 + $0x78] sm:$0x33] %v844_v4  ;;  %859 = vst [vmem:[#allocation4 + $0x80] sm:$0x33] %v846_v6  ;;  %v927_v10 = vrot.slane %v917_v7, 4  ;;  %v926_v9 = vrot.slane %v915_v8, 4 }
  0xb5   : > { %v932_v11 = vsel %vm338_vm6, %v926_v9, %v927_v10 }
  0xb6   : > { %v934_v13 = vsel %vm933_vm13, %v915_v8, %v932_v11  ;;  %v1005_v15 = vpop.permute.xlu1 %1004  ;;  %v3000_v16 = vpop.permute.xlu0 %918 }
  0xb7   : > { %948 = vst [vmem:[#allocation4 + $0x78] sm:$0xcc] %v934_v13  ;;  %v928_v17 = vrot.slane %v3000_v16, 4  ;;  %v1016_v19 = vrot.slane %v1005_v15, 4 }
  0xb9   : > { %v935_v20 = vsel %vm338_vm6, %v927_v10, %v928_v17 }
  0xba   : > { %v936_v22 = vsel %vm933_vm13, %v917_v7, %v935_v20  ;;  %v3007_v23 = vpop.permute.xlu1 %1008  ;;  %v1007_v24 = vpop.permute.xlu0 %1006 }
  0xbb   : > { %949 = vst [vmem:[#allocation4 + $0x80] sm:$0xcc] %v936_v22  ;;  %v1018_v25 = vrot.slane %v3007_v23, 4  ;;  %v1017_v26 = vrot.slane %v1007_v24, 4 }
  0xbd   : > { %v1022_v27 = vsel %vm338_vm6, %v1016_v19, %v1017_v26  ;;  %v1025_v28 = vsel %vm338_vm6, %v1017_v26, %v1018_v25 }
  0xbe   : > { %v1024_v29 = vsel %vm1023_vm14, %v1005_v15, %v1022_v27  ;;  %v1026_v30 = vsel %vm1023_vm14, %v1007_v24, %v1025_v28  ;;  %v3016_v31 = vpop.permute.xlu1 %328  ;;  %v327_v33 = vpop.permute.xlu0 %326  ;;  %v2741_v35 = vld [vmem:[#allocation4 + $0x54] ss:$40 sps:$4 sm:$0xff]   ;;  %v2743_v37 = vld [vmem:[#allocation4 + $0x50] ss:$40 sps:$4 sm:$0xff]  }
  0xbf   : > { %1038 = vst [vmem:[#allocation4 + $0xa0] sm:$0x33] %v1024_v29  ;;  %1039 = vst [vmem:[#allocation4 + $0xa8] sm:$0x33] %v1026_v30  ;;  %v336_v38 = vrot.slane %v3016_v31, 4  ;;  %v335_v39 = vrot.slane %v327_v33, 4  ;;  %1236 = vmatprep.subr.bf16.mxu0 %v2741_v35 }
  0xc0   : > { %1237 = vmatpush1.bf16.msra.mxu0 %v2743_v37 }
  0xc1   : > { %v344_v40 = vsel %vm338_vm6, %v334_v34, %v335_v39  ;;  %v346_v41 = vsel %vm338_vm6, %v335_v39, %v336_v38 }
  0xc2   : > { %v345_v42 = vsel %vm340_vm10, %v2944_v2, %v344_v40  ;;  %v347_v43 = vsel %vm340_vm10, %v327_v33, %v346_v41  ;;  %v3028_v44 = vpop.permute.xlu1 %419  ;;  %v418_v45 = vpop.permute.xlu0 %417  ;;  %v2744_v46 = vld [vmem:[#allocation4 + $0x5c] ss:$40 sps:$4 sm:$0xff]   ;;  %v2746_v47 = vld [vmem:[#allocation4 + $0x58] ss:$40 sps:$4 sm:$0xff]  }
  0xc3   : > { %357 = vst [vmem:[#allocation4 + $0x10] sm:$0x33] %v345_v42  ;;  %358 = vst [vmem:[#allocation4 + $0x18] sm:$0x33] %v347_v43  ;;  %v427_v48 = vrot.slane %v3028_v44, 4  ;;  %v426_v34 = vrot.slane %v418_v45, 4  ;;  %1277 = vmatprep.subr.bf16.mxu1 %v2744_v46 }
  0xc4   : > { %1278 = vmatpush1.bf16.msra.mxu1 %v2746_v47 }
  0xc5   : > { %v434_v49 = vsel %vm338_vm6, %v425_v14, %v426_v34  ;;  %v436_v2 = vsel %vm338_vm6, %v426_v34, %v427_v48 }
  0xc6   : > { %v435_v50 = vsel %vm430_vm7, %v2948_v12, %v434_v49  ;;  %v437_v53 = vsel %vm430_vm7, %v418_v45, %v436_v2  ;;  %v3040_v54 = vpop.permute.xlu1 %509  ;;  %v508_v55 = vpop.permute.xlu0 %507  ;;  %v1064_v57 = vld [vmem:[#allocation4 + $0xa0] sm:$0x33]  ;;  %v1065_v58 = vld [vmem:[#allocation4 + $0xa8] sm:$0x33] }
  0xc7   : > { %447 = vst [vmem:[#allocation4 + $0x10] sm:$0xcc] %v435_v50  ;;  %448 = vst [vmem:[#allocation4 + $0x18] sm:$0xcc] %v437_v53  ;;  %v517_v60 = vrot.slane %v3040_v54, 4  ;;  %v516_v14 = vrot.slane %v508_v55, 4  ;;  %v2608_v61 = vcombine.high %v1064_v57, %v1064_v57  ;;  %v2610_v62 = vcombine.high %v1065_v58, %v1065_v58 }
  0xc8   : > { %v2607_v63 = vcombine.low %v1064_v57, %v1064_v57  ;;  %v2609_v0 = vcombine.low %v1065_v58, %v1065_v58 }
  0xc9   : > { %v524_v12 = vsel %vm338_vm6, %v515_v21, %v516_v14  ;;  %v526_v1 = vsel %vm338_vm6, %v516_v14, %v517_v60  ;;  %2617 = vmatprep.subr.msk.bf16.mxu0 %vm263_vm3, %v2608_v61  ;;  %2619 = vmatprep.subr.msk.bf16.mxu1 %vm263_vm3, %v2610_v62 }
  0xca   : > { %v525_v4 = vsel %vm520_vm8, %v2955_v18, %v524_v12  ;;  %v527_v6 = vsel %vm520_vm8, %v508_v55, %v526_v1  ;;  %v3054_v7 = vpop.permute.xlu1 %599  ;;  %v1205_v8 = vsel %vm263_vm3, %v2607_v63, 0  ;;  %v1211_v10 = vsel %vm263_vm3, %v2609_v0, 0  ;;  %v598_v21 = vpop.permute.xlu0 %597  ;;  %v3062_v18 = vld [vmem:[%s3563_s2] sm:$0xf] }
  0xcb   : > { %537 = vst [vmem:[#allocation4 + $0x38] sm:$0x33] %v525_v4  ;;  %538 = vst [vmem:[#allocation4 + $0x40] sm:$0x33] %v527_v6  ;;  %v607_v9 = vrot.slane %v3054_v7, 4  ;;  %1239 = vmatpush1.bf16.msra.mxu0 %v1205_v8  ;;  %1280 = vmatpush1.bf16.msra.mxu1 %v1211_v10  ;;  %v606_v11 = vrot.slane %v598_v21, 4 }
  0xcd   : > { %v614_v13 = vsel %vm338_vm6, %v605_v36, %v606_v11  ;;  %v616_v15 = vsel %vm338_vm6, %v606_v11, %v607_v9 }
  0xce   : > { %v615_v19 = vsel %vm610_vm9, %v2966_v32, %v614_v13  ;;  %v617_v20 = vsel %vm610_vm9, %v598_v21, %v616_v15  ;;  %2618 = vmatmul.mubr.msk.bf16.vlgmr.msra.gmra.mrb[0].mxu0 %vm1200_vm15, %v3062_v18  ;;  %2620 = vmatmul.mubr.msk.bf16.vlgmr.msra.gmra.mrb[0].mxu1 %vm1200_vm15, %v3062_v18  ;;  %v3077_v22 = vpop.permute.xlu1 %742  ;;  %v741_v24 = vpop.permute.xlu0 %740 }
  0xcf   : > { %627 = vst [vmem:[#allocation4 + $0x38] sm:$0xcc] %v615_v19  ;;  %628 = vst [vmem:[#allocation4 + $0x40] sm:$0xcc] %v617_v20  ;;  %v750_v36 = vrot.slane %v3077_v22, 4  ;;  %v749_v26 = vrot.slane %v741_v24, 4  ;;  %1348 = vmatprep.mubr.bf16.mxu0 %v2784_v3  ;;  %1389 = vmatprep.mubr.bf16.mxu1 %v2784_v3 }
  0xd1   : > { %v757_v32 = vsel %vm338_vm6, %v748_v52, %v749_v26  ;;  %v759_v27 = vsel %vm338_vm6, %v749_v26, %v750_v36 }
  0xd2   : > { %v758_v28 = vsel %vm753_vm11, %v2982_v51, %v757_v32  ;;  %v760_v29 = vsel %vm753_vm11, %v741_v24, %v759_v27  ;;  %v3091_v30 = vpop.permute.xlu1 %832  ;;  %v831_v33 = vpop.permute.xlu0 %830 }
  0xd3   : > { %770 = vst [vmem:[#allocation4 + $0x60] sm:$0xcc] %v758_v28  ;;  %771 = vst [vmem:[#allocation4 + $0x68] sm:$0xcc] %v760_v29  ;;  %v840_v35 = vrot.slane %v3091_v30, 4  ;;  %v839_v37 = vrot.slane %v831_v33, 4 }
  0xd5   : > { %v847_v52 = vsel %vm338_vm6, %v838_v59, %v839_v37  ;;  %v849_v39 = vsel %vm338_vm6, %v839_v37, %v840_v35 }
  0xd6   : > { %v848_v51 = vsel %vm843_vm12, %v2989_v56, %v847_v52  ;;  %v850_v40 = vsel %vm843_vm12, %v831_v33, %v849_v39  ;;  %v3103_v41 = vpop.permute.xlu1 %922  ;;  %v921_v42 = vpop.permute.xlu0 %920  ;;  %v2751_v43 = vld [vmem:[#allocation4 + $0x10] ss:$40 sps:$4 sm:$0xff]   ;;  %v2753_v45 = vld [vmem:[#allocation4 + $0x14] ss:$40 sps:$4 sm:$0xff]  }
  0xd7   : > { %860 = vst [vmem:[#allocation4 + $0x88] sm:$0x33] %v848_v51  ;;  %861 = vst [vmem:[#allocation4 + $0x90] sm:$0x33] %v850_v40  ;;  %v930_v46 = vrot.slane %v3103_v41, 4  ;;  %v929_v47 = vrot.slane %v921_v42, 4  ;;  %1316 = vmatprep.subr.bf16.mxu0 %v2753_v45 }
  0xd8   : > { %v2754_v59 = vld [vmem:[#allocation4 + $0x18] ss:$40 sps:$4 sm:$0xff]   ;;  %v2756_v34 = vld [vmem:[#allocation4 + $0x1c] ss:$40 sps:$4 sm:$0xff]   ;;  %1317 = vmatpush1.bf16.msra.mxu0 %v2751_v43 }
  0xd9   : > { %v937_v49 = vsel %vm338_vm6, %v928_v17, %v929_v47  ;;  %v939_v56 = vsel %vm338_vm6, %v929_v47, %v930_v46  ;;  %1357 = vmatprep.subr.bf16.mxu1 %v2756_v34 }
  0xda   : > { %v938_v2 = vsel %vm933_vm13, %v3000_v16, %v937_v49  ;;  %v940_v50 = vsel %vm933_vm13, %v921_v42, %v939_v56  ;;  %v3115_v53 = vpop.permute.xlu1 %1012  ;;  %v1011_v55 = vpop.permute.xlu0 %1010  ;;  %1358 = vmatpush1.bf16.msra.mxu1 %v2754_v59 }
  0xdb   : > { %950 = vst [vmem:[#allocation4 + $0x88] sm:$0xcc] %v938_v2  ;;  %951 = vst [vmem:[#allocation4 + $0x90] sm:$0xcc] %v940_v50  ;;  %v1020_v57 = vrot.slane %v3115_v53, 4  ;;  %v1019_v17 = vrot.slane %v1011_v55, 4 }
  0xdc   : > { %v1773_v50 = vld [vmem:[#allocation3 + $0x2c] sm:$0xf] }
  0xdd   : > { %v1027_v58 = vsel %vm338_vm6, %v1018_v25, %v1019_v17  ;;  %v1029_v16 = vsel %vm338_vm6, %v1019_v17, %v1020_v57  ;;  %1790 = vrot.lane.b32.xlu1 %v1773_v50, %s2789_s7  ;;  %v1449_v17 = vld [vmem:[%s3562_s1] sm:$0xff] }
  0xde   : > { %v1028_v14 = vsel %vm1023_vm14, %v3007_v23, %v1027_v58  ;;  %v1030_v61 = vsel %vm1023_vm14, %v1011_v55, %v1029_v16  ;;  %v422_v62 = vpop.permute.xlu1 %421  ;;  %v331_v63 = vpop.permute.xlu0 %330  ;;  %v1463_v55 = vsub.s32 2, %v2846_v5  ;;  %v1459_v58 = vsub.s32 1, %v2846_v5 }
  0xdf   : > { %1040 = vst [vmem:[#allocation4 + $0xb0] sm:$0x33] %v1028_v14  ;;  %1041 = vst [vmem:[#allocation4 + $0xb8] sm:$0x33] %v1030_v61  ;;  %v428_v0 = vrot.slane %v422_v62, 4  ;;  %v337_v12 = vrot.slane %v331_v63, 4 }
  0xe0   : > { %v1467_v16 = vsub.s32 3, %v2846_v5 }
  0xe1   : > { %v438_v1 = vsel %vm338_vm6, %v427_v48, %v428_v0  ;;  %v348_v25 = vsel %vm338_vm6, %v336_v38, %v337_v12 }
  0xe2   : > { %v439_v4 = vsel %vm430_vm7, %v3028_v44, %v438_v1  ;;  %v349_v23 = vsel %vm340_vm10, %v3016_v31, %v348_v25  ;;  %v602_v6 = vpop.permute.xlu1 %601  ;;  %v512_v8 = vpop.permute.xlu0 %511  ;;  %v2757_v10 = vld [vmem:[#allocation4 + $0x60] ss:$40 sps:$4 sm:$0xff]   ;;  %v2759_v21 = vld [vmem:[#allocation4 + $0x64] ss:$40 sps:$4 sm:$0xff]   ;;  %v1464_v1 = vrot.slane %v1449_v17, %v1463_v55 }
  0xe3   : > { %449 = vst [vmem:[#allocation4 + $0x20] sm:$0xcc] %v439_v4  ;;  %359 = vst [vmem:[#allocation4 + $0x20] sm:$0x33] %v349_v23  ;;  %v608_v11 = vrot.slane %v602_v6, 4  ;;  %v518_v13 = vrot.slane %v512_v8, 4  ;;  %1318 = vmatprep.subr.bf16.mxu0 %v2759_v21  ;;  %v1460_v4 = vrot.slane %v1449_v17, %v1459_v58  ;;  %v1468_v6 = vrot.slane %v1449_v17, %v1467_v16 }
  0xe4   : > { %v2760_v15 = vld [vmem:[#allocation4 + $0x68] ss:$40 sps:$4 sm:$0xff]   ;;  %v2762_v48 = vld [vmem:[#allocation4 + $0x6c] ss:$40 sps:$4 sm:$0xff]   ;;  %1319 = vmatpush1.bf16.msra.mxu0 %v2757_v10  ;;  %v1450_v16 = vld [vmem:[%s3562_s1 + $0x8] sm:$0x3] }
  0xe5   : > { %v618_v38 = vsel %vm338_vm6, %v607_v9, %v608_v11  ;;  %v528_v44 = vsel %vm338_vm6, %v517_v60, %v518_v13  ;;  %1359 = vmatprep.subr.bf16.mxu1 %v2762_v48 }
  0xe6   : > { %v619_v31 = vsel %vm610_vm9, %v3054_v7, %v618_v38  ;;  %v529_v19 = vsel %vm520_vm8, %v3040_v54, %v528_v44  ;;  %v835_v20 = vpop.permute.xlu1 %834  ;;  %v745_v24 = vpop.permute.xlu0 %744  ;;  %v1066_v26 = vld [vmem:[#allocation4 + $0xb0] sm:$0x33]  ;;  %v1067_v32 = vld [vmem:[#allocation4 + $0xb8] sm:$0x33]  ;;  %1360 = vmatpush1.bf16.msra.mxu1 %v2760_v15 }
  0xe7   : > { %629 = vst [vmem:[#allocation4 + $0x48] sm:$0xcc] %v619_v31  ;;  %539 = vst [vmem:[#allocation4 + $0x48] sm:$0x33] %v529_v19  ;;  %v841_v27 = vrot.slane %v835_v20, 4  ;;  %v751_v9 = vrot.slane %v745_v24, 4  ;;  %v2612_v28 = vcombine.high %v1066_v26, %v1066_v26  ;;  %v2614_v29 = vcombine.high %v1067_v32, %v1067_v32 }
  0xe8   : > { %v2611_v60 = vcombine.low %v1066_v26, %v1066_v26  ;;  %v2613_v33 = vcombine.low %v1067_v32, %v1067_v32 }
  0xe9   : > { %v851_v7 = vsel %vm338_vm6, %v840_v35, %v841_v27  ;;  %v761_v54 = vsel %vm338_vm6, %v750_v36, %v751_v9  ;;  %2621 = vmatprep.subr.msk.bf16.mxu0 %vm263_vm3, %v2612_v28  ;;  %2623 = vmatprep.subr.msk.bf16.mxu1 %vm263_vm3, %v2614_v29  ;;  %v1471_v9 = vsub.s32 4, %v2846_v5  ;;  %v1479_v28 = vsub.s32 6, %v2846_v5 }
  0xea   : > { %v852_v37 = vsel %vm843_vm12, %v3091_v30, %v851_v7  ;;  %v762_v52 = vsel %vm753_vm11, %v3077_v22, %v761_v54  ;;  %v1015_v39 = vpop.permute.xlu1 %1014  ;;  %v1217_v51 = vsel %vm263_vm3, %v2611_v60, 0  ;;  %v1223_v40 = vsel %vm263_vm3, %v2613_v33, 0  ;;  %v925_v35 = vpop.permute.xlu0 %924 }
  0xeb   : > { %862 = vst [vmem:[#allocation4 + $0x98] sm:$0x33] %v852_v37  ;;  %772 = vst [vmem:[#allocation4 + $0x70] sm:$0xcc] %v762_v52  ;;  %v1021_v42 = vrot.slane %v1015_v39, 4  ;;  %1321 = vmatpush1.bf16.msra.mxu0 %v1217_v51  ;;  %1362 = vmatpush1.bf16.msra.mxu1 %v1223_v40  ;;  %v931_v36 = vrot.slane %v925_v35, 4  ;;  %v1472_v7 = vrot.slane %v1449_v17, %v1471_v9 }
  0xec   : > { %v1475_v29 = vsub.s32 5, %v2846_v5  ;;  %v1483_v60 = vsub.s32 7, %v2846_v5  ;;  %v1480_v39 = vrot.slane %v1449_v17, %v1479_v28 }
  0xed   : > { %v1031_v43 = vsel %vm338_vm6, %v1020_v57, %v1021_v42  ;;  %v941_v22 = vsel %vm338_vm6, %v930_v46, %v931_v36 }
  0xee   : > { %v1032_v30 = vsel %vm1023_vm14, %v3115_v53, %v1031_v43  ;;  %v942_v45 = vsel %vm933_vm13, %v3103_v41, %v941_v22  ;;  %2622 = vmatmul.mubr.msk.bf16.vlgmr.msra.gmra.mrb[4].mxu0 %vm1200_vm15, %v3062_v18  ;;  %2624 = vmatmul.mubr.msk.bf16.vlgmr.msra.gmra.mrb[4].mxu1 %vm1200_vm15, %v3062_v18  ;;  %v2767_v47 = vld [vmem:[#allocation4 + $0x20] ss:$40 sps:$4 sm:$0xff]   ;;  %v2769_v59 = vld [vmem:[#allocation4 + $0x24] ss:$40 sps:$4 sm:$0xff]   ;;  %v1455_v53 = vsub.s32 0, %v2846_v5  ;;  %v1476_v40 = vrot.slane %v1449_v17, %v1475_v29 }
  0xef   : > { %1042 = vst [vmem:[#allocation4 + $0xc0] sm:$0x33] %v1032_v30  ;;  %952 = vst [vmem:[#allocation4 + $0x98] sm:$0xcc] %v942_v45  ;;  %1430 = vmatprep.mubr.bf16.mxu0 %v2784_v3  ;;  %2312 = vmatprep.mubr.bf16.mxu1 %v2784_v3  ;;  %v1484_v43 = vrot.slane %v1449_v17, %v1483_v60 }
  0xf0   : > { %1398 = vmatprep.subr.bf16.mxu0 %v2769_v59  ;;  %v1456_v63 = vrot.slane %v1449_v17, %v1455_v53 }
  0xf1   : > { %1399 = vmatpush1.bf16.msra.mxu0 %v2767_v47 }
  0xf6   : > { %v2770_v46 = vld [vmem:[#allocation4 + $0x70] ss:$40 sps:$4 sm:$0xff]   ;;  %v2772_v34 = vld [vmem:[#allocation4 + $0x74] ss:$40 sps:$4 sm:$0xff]   ;;  %v1068_v49 = vld [vmem:[#allocation4 + $0xc0] sm:$0x33] }
  0xf7   : > { %1400 = vmatprep.subr.bf16.mxu0 %v2772_v34  ;;  %v2616_v41 = vcombine.high %v1068_v49, %v1068_v49  ;;  %v2615_v56 = vcombine.low %v1068_v49, %v1068_v49 }
  0xf8   : > { %1401 = vmatpush1.bf16.msra.mxu0 %v2770_v46 }
  0xf9   : > { %2625 = vmatprep.subr.msk.bf16.mxu0 %vm263_vm3, %v2616_v41  ;;  %v1229_v2 = vsel %vm263_vm3, %v2615_v56, 0 }
  0xfb   : > { %v3185_v57 = vpop.permute.xlu0 %1072 }
  0xfc   : > { %1403 = vmatpush1.bf16.msra.mxu0 %v1229_v2 }
  0xff   : > { %2626 = vmatmul.mubr.msk.bf16.vlgmr.msra.gmra.mrb[8].mxu0 %vm1200_vm15, %v3062_v18 }
 0x100   : > { %2353 = vmatprep.mubr.bf16.mxu0 %v2784_v3 }
 0x1a1   : > { %v1268_v18 = vpop.f32.mrb[0].mxu0  ;;  %v1309_v14 = vpop.f32.mrb[0].mxu1 }
 0x1a2   : > { %v1269_v61 = vadd.f32 %v1268_v18, %v3185_v57  ;;  %v1270_v62 = vpop.f32.mrb[1].mxu0  ;;  %v1310_v0 = vadd.f32 %v1309_v14, %v3185_v57  ;;  %v1311_v12 = vpop.f32.mrb[1].mxu1 }
 0x1a3   : > { %v1271_v25 = vadd.f32 %v1270_v62, %v3185_v57  ;;  %v1312_v23 = vadd.f32 %v1311_v12, %v3185_v57  ;;  %v1272_v8 = vpop.f32.mrb[2].mxu0  ;;  %v1313_v10 = vpop.f32.mrb[2].mxu1  ;;  %v1488_v62 = vrot.slane %v1450_v16, %v1455_v53  ;;  %v1492_v12 = vrot.slane %v1450_v16, %v1459_v58 }
 0x1a4   : > { %v1439_v21 = vmax.f32 %v1269_v61, 0.0  ;;  %v1441_v11 = vmax.f32 %v1310_v0, 0.0  ;;  %v1273_v13 = vpop.f32.mrb[3].mxu0  ;;  %v1314_v15 = vpop.f32.mrb[3].mxu1 }
 0x1a5   : > { %v1440_v48 = vmax.f32 %v1271_v25, 0.0  ;;  %v1442_v38 = vmax.f32 %v1312_v23, 0.0  ;;  %v1823_v13 = vld [vmem:[#allocation3 + $0x2c] sm:$0xf] }
 0x1a6   : > { %v1503_v44 = vmul.f32 %v1456_v63, %v1439_v21  ;;  %v1505_v31 = vmul.f32 %v1464_v1, %v1441_v11  ;;  %v1873_v15 = vld [vmem:[#allocation3 + $0x2c] sm:$0xf] }
 0x1a7   : > { %v1504_v19 = vmul.f32 %v1460_v4, %v1440_v48  ;;  %v1506_v20 = vmul.f32 %v1468_v6, %v1442_v38  ;;  %v1923_v48 = vld [vmem:[#allocation3 + $0x2c] sm:$0xf]  ;;  %v2014_v38 = vld [vmem:[%s3566_s5] sm:$0xf] }
 0x1a9   : > { %v3200_v24 = vpack.c.bf16 %v1504_v19, %v1503_v44  ;;  %v3202_v26 = vpack.c.bf16 %v1506_v20, %v1505_v31  ;;  %v3302_v44 = vpop.permute.xlu1 %1790 }
 0x1ab   : > { %1553 = vst [vmem:[#allocation3 + $0x4] sm:$0xff] %v3200_v24  ;;  %1554 = vst [vmem:[#allocation3 + $0xc] sm:$0xff] %v3202_v26 }
 0x1b2   : > { %v1608_v32 = vld [vmem:[#allocation3] sm:$0xff]  ;;  %v1559_v27 = vld [vmem:[#allocation3 + $0x8] sm:$0xff] }
 0x1b3   : > { %1620 = vrot.lane.b32.xlu0 %v1608_v32, %s2786_s28  ;;  %1570 = vrot.lane.b32.xlu1 %v1608_v32, %s2785_s27 }
 0x1b7   : > { %1670 = vrot.lane.b32.xlu0 %v1608_v32, %s2787_s29  ;;  %1572 = vrot.lane.b32.xlu1 %v1559_v27, %s2785_s27 }
 0x1bb   : > { %1720 = vrot.lane.b32.xlu0 %v1608_v32, %s2788_s30  ;;  %1622 = vrot.lane.b32.xlu1 %v1559_v27, %s2786_s28 }
 0x1bf   : > { %1780 = vrot.lane.b32.xlu0 %v3200_v24, %s2789_s7  ;;  %1672 = vrot.lane.b32.xlu1 %v1559_v27, %s2787_s29 }
 0x1c1   : > { %v1350_v33 = vpop.f32.mrb[4].mxu0  ;;  %v1391_v54 = vpop.f32.mrb[4].mxu1 }
 0x1c2   : > { %v1351_v37 = vadd.f32 %v1350_v33, %v3185_v57  ;;  %v1392_v52 = vadd.f32 %v1391_v54, %v3185_v57  ;;  %v1352_v51 = vpop.f32.mrb[5].mxu0  ;;  %v1393_v35 = vpop.f32.mrb[5].mxu1 }
 0x1c3   : > { %v1353_v42 = vadd.f32 %v1352_v51, %v3185_v57  ;;  %v1394_v36 = vadd.f32 %v1393_v35, %v3185_v57  ;;  %v1354_v22 = vpop.f32.mrb[6].mxu0  ;;  %1830 = vrot.lane.b32.xlu0 %v3200_v24, %s2790_s8  ;;  %1722 = vrot.lane.b32.xlu1 %v1559_v27, %s2788_s30  ;;  %v1395_v30 = vpop.f32.mrb[6].mxu1 }
 0x1c4   : > { %v1443_v45 = vmax.f32 %v1351_v37, 0.0  ;;  %v1445_v47 = vmax.f32 %v1392_v52, 0.0  ;;  %v1355_v59 = vpop.f32.mrb[7].mxu0  ;;  %v1396_v46 = vpop.f32.mrb[7].mxu1 }
 0x1c5   : > { %v1444_v34 = vmax.f32 %v1353_v42, 0.0  ;;  %v1446_v49 = vmax.f32 %v1394_v36, 0.0 }
 0x1c6   : > { %v1507_v41 = vmul.f32 %v1472_v7, %v1443_v45  ;;  %v1509_v56 = vmul.f32 %v1480_v39, %v1445_v47 }
 0x1c7   : > { %v1508_v2 = vmul.f32 %v1476_v40, %v1444_v34  ;;  %v1510_v50 = vmul.f32 %v1484_v43, %v1446_v49  ;;  %1880 = vrot.lane.b32.xlu0 %v3200_v24, %s2791_s9  ;;  %1782 = vrot.lane.b32.xlu1 %v3202_v26, %s2789_s7 }
 0x1c9   : > { %v3230_v55 = vpack.c.bf16 %v1508_v2, %v1507_v41  ;;  %v3232_v17 = vpack.c.bf16 %v1510_v50, %v1509_v56 }
 0x1cb   : > { %1555 = vst [vmem:[#allocation3 + $0x14] sm:$0xff] %v3230_v55  ;;  %1556 = vst [vmem:[#allocation3 + $0x1c] sm:$0xff] %v3232_v17  ;;  %1930 = vrot.lane.b32.xlu0 %v3200_v24, %s2792_s10  ;;  %1832 = vrot.lane.b32.xlu1 %v3202_v26, %s2790_s8 }
 0x1cf   : > { %1882 = vrot.lane.b32.xlu1 %v3202_v26, %s2791_s9 }
 0x1d2   : > { %v1560_v18 = vld [vmem:[#allocation3 + $0x10] sm:$0xff]  ;;  %v1432_v14 = vpop.f32.mrb[8].mxu0  ;;  %v1561_v4 = vld [vmem:[#allocation3 + $0x18] sm:$0xff] }
 0x1d3   : > { %1574 = vrot.lane.b32.xlu0 %v1560_v18, %s2785_s27  ;;  %1932 = vrot.lane.b32.xlu1 %v3202_v26, %s2792_s10  ;;  %v1433_v61 = vadd.f32 %v1432_v14, %v3185_v57  ;;  %v1434_v63 = vpop.f32.mrb[9].mxu0 }
 0x1d4   : > { %v1435_v0 = vadd.f32 %v1434_v63, %v3185_v57  ;;  %v1436_v1 = vpop.f32.mrb[10].mxu0 }
 0x1d5   : > { %v1447_v25 = vmax.f32 %v1433_v61, 0.0  ;;  %v1437_v23 = vpop.f32.mrb[11].mxu0 }
 0x1d6   : > { %v1448_v6 = vmax.f32 %v1435_v0, 0.0 }
 0x1d7   : > { %1624 = vrot.lane.b32.xlu0 %v1560_v18, %s2786_s28  ;;  %1576 = vrot.lane.b32.xlu1 %v1561_v4, %s2785_s27  ;;  %v1511_v8 = vmul.f32 %v1488_v62, %v1447_v25 }
 0x1d8   : > { %v1512_v10 = vmul.f32 %v1492_v12, %v1448_v6 }
 0x1da   : > { %v3256_v21 = vpack.c.bf16 %v1512_v10, %v1511_v8 }
 0x1db   : > { %1674 = vrot.lane.b32.xlu0 %v1560_v18, %s2787_s29  ;;  %1626 = vrot.lane.b32.xlu1 %v1561_v4, %s2786_s28 }
 0x1dc   : > { %1557 = vst [vmem:[#allocation3 + $0x24] sm:$0xff] %v3256_v21 }
 0x1df   : > { %1724 = vrot.lane.b32.xlu0 %v1560_v18, %s2788_s30  ;;  %1676 = vrot.lane.b32.xlu1 %v1561_v4, %s2787_s29 }
 0x1e3   : > { %1784 = vrot.lane.b32.xlu0 %v3230_v55, %s2789_s7  ;;  %1726 = vrot.lane.b32.xlu1 %v1561_v4, %s2788_s30  ;;  %v1562_v5 = vld [vmem:[#allocation3 + $0x20] sm:$0xff]  ;;  %v1563_v53 = vld [vmem:[#allocation3 + $0x28] sm:$0xf] }
 0x1e4   : > { %v1613_v57 = vld [vmem:[#allocation3 + $0x28] sm:$0xf] }
 0x1e5   : > { %v1663_v58 = vld [vmem:[#allocation3 + $0x28] sm:$0xf] }
 0x1e6   : > { %v1713_v11 = vld [vmem:[#allocation3 + $0x28] sm:$0xf] }
 0x1e7   : > { %1834 = vrot.lane.b32.xlu0 %v3230_v55, %s2790_s8  ;;  %1786 = vrot.lane.b32.xlu1 %v3232_v17, %s2789_s7 }
 0x1eb   : > { %1884 = vrot.lane.b32.xlu0 %v3230_v55, %s2791_s9  ;;  %1836 = vrot.lane.b32.xlu1 %v3232_v17, %s2790_s8 }
 0x1ef   : > { %1934 = vrot.lane.b32.xlu0 %v3230_v55, %s2792_s10  ;;  %1886 = vrot.lane.b32.xlu1 %v3232_v17, %s2791_s9 }
 0x1f3   : > { %1578 = vrot.lane.b32.xlu0 %v1562_v5, %s2785_s27  ;;  %1936 = vrot.lane.b32.xlu1 %v3232_v17, %s2792_s10 }
 0x1f7   : > { %1628 = vrot.lane.b32.xlu0 %v1562_v5, %s2786_s28  ;;  %1580 = vrot.lane.b32.xlu1 %v1563_v53, %s2785_s27 }
 0x1fb   : > { %1678 = vrot.lane.b32.xlu0 %v1562_v5, %s2787_s29  ;;  %1630 = vrot.lane.b32.xlu1 %v1613_v57, %s2786_s28  ;;  %s3551_s28 = scalar_lea.vmem %s3567_s6, %s2700_s25 }
 0x1ff   : > { %1728 = vrot.lane.b32.xlu0 %v1562_v5, %s2788_s30  ;;  %1680 = vrot.lane.b32.xlu1 %v1663_v58, %s2787_s29 }
 0x203   : > { %1788 = vrot.lane.b32.xlu0 %v3256_v21, %s2789_s7  ;;  %1730 = vrot.lane.b32.xlu1 %v1713_v11, %s2788_s30 }
 0x207   : > { %1838 = vrot.lane.b32.xlu0 %v3256_v21, %s2790_s8  ;;  %1840 = vrot.lane.b32.xlu1 %v1823_v13, %s2790_s8 }
 0x20b   : > { %1888 = vrot.lane.b32.xlu0 %v3256_v21, %s2791_s9  ;;  %1890 = vrot.lane.b32.xlu1 %v1873_v15, %s2791_s9 }
 0x20f   : > { %1938 = vrot.lane.b32.xlu0 %v3256_v21, %s2792_s10  ;;  %1940 = vrot.lane.b32.xlu1 %v1923_v48, %s2792_s10 }
 0x213   : > { %2017 = vperm.xlu0 %2719, %v2014_v38  }
 0x225   : > { %v1621_v31 = vpop.permute.xlu0 %1620  ;;  %v1571_v19 = vpop.permute.xlu1 %1570 }
 0x226   : > { %v1582_v9 = vrot.slane %v1571_v19, 4  ;;  %v1632_v60 = vrot.slane %v1621_v31, 4 }
 0x229   : > { %v1671_v20 = vpop.permute.xlu0 %1670  ;;  %v3304_v32 = vpop.permute.xlu1 %1572 }
 0x22a   : > { %v1583_v27 = vrot.slane %v3304_v32, 4  ;;  %v1682_v36 = vrot.slane %v1671_v20, 4 }
 0x22c   : > { %v1588_v33 = vsel %vm338_vm6, %v1582_v9, %v1583_v27 }
 0x22d   : > { %v1721_v28 = vpop.permute.xlu0 %1720  ;;  %v3307_v29 = vpop.permute.xlu1 %1622  ;;  %v1589_v39 = vsel %vm340_vm10, %v1571_v19, %v1588_v33 }
 0x22e   : > { %v1633_v7 = vrot.slane %v3307_v29, 4  ;;  %v1732_v30 = vrot.slane %v1721_v28, 4 }
 0x230   : > { %v1638_v54 = vsel %vm338_vm6, %v1632_v60, %v1633_v7 }
 0x231   : > { %v1781_v37 = vpop.permute.xlu0 %1780  ;;  %v3314_v52 = vpop.permute.xlu1 %1672  ;;  %v1639_v51 = vsel %vm430_vm7, %v1621_v31, %v1638_v54 }
 0x232   : > { %v1683_v40 = vrot.slane %v3314_v52, 4  ;;  %v2632_v35 = vcombine.low %v1589_v39, %v1639_v51  ;;  %v2633_v42 = vcombine.high %v1589_v39, %v1639_v51  ;;  %v1792_v41 = vrot.slane %v1781_v37, 4 }
 0x234   : > { %2280 = vmatprep.subr.bf16.mxu1 %v2633_v42  ;;  %v1688_v45 = vsel %vm338_vm6, %v1682_v36, %v1683_v40 }
 0x235   : > { %v1831_v43 = vpop.permute.xlu0 %1830  ;;  %2281 = vmatpush1.bf16.msra.mxu1 %v2632_v35  ;;  %v3319_v22 = vpop.permute.xlu1 %1722  ;;  %v1689_v34 = vsel %vm520_vm8, %v1671_v20, %v1688_v45  ;;  %v3377_v35 = vld [vmem:[%s3565_s4] sm:$0x3] }
 0x236   : > { %v1733_v47 = vrot.slane %v3319_v22, 4  ;;  %v1842_v12 = vrot.slane %v1831_v43, 4 }
 0x238   : > { %v1738_v59 = vsel %vm338_vm6, %v1732_v30, %v1733_v47 }
 0x239   : > { %v3328_v46 = vpop.permute.xlu1 %1782  ;;  %v1739_v49 = vsel %vm610_vm9, %v1721_v28, %v1738_v59  ;;  %v1881_v16 = vpop.permute.xlu0 %1880 }
 0x23a   : > { %v1793_v56 = vrot.slane %v3328_v46, 4  ;;  %v2642_v2 = vcombine.low %v1689_v34, %v1739_v49  ;;  %v2643_v50 = vcombine.high %v1689_v34, %v1739_v49  ;;  %v1892_v4 = vrot.slane %v1881_v16, 4 }
 0x23c   : > { %v1798_v18 = vsel %vm338_vm6, %v1792_v41, %v1793_v56  ;;  %2282 = vmatprep.subr.bf16.mxu1 %v2643_v50 }
 0x23d   : > { %2283 = vmatpush1.bf16.msra.mxu1 %v2642_v2  ;;  %v3336_v14 = vpop.permute.xlu1 %1832  ;;  %v1799_v61 = vsel %vm753_vm11, %v1781_v37, %v1798_v18  ;;  %v1931_v1 = vpop.permute.xlu0 %1930 }
 0x23e   : > { %v1843_v62 = vrot.slane %v3336_v14, 4  ;;  %v2652_v63 = vcombine.low %v3200_v24, %v1799_v61  ;;  %v2653_v0 = vcombine.high %v3200_v24, %v1799_v61  ;;  %v1942_v10 = vrot.slane %v1931_v1, 4 }
 0x240   : > { %2284 = vmatprep.subr.bf16.mxu1 %v2653_v0  ;;  %v1848_v23 = vsel %vm338_vm6, %v1842_v12, %v1843_v62 }
 0x241   : > { %2285 = vmatpush1.bf16.msra.mxu1 %v2652_v63  ;;  %v3342_v25 = vpop.permute.xlu1 %1882  ;;  %v1849_v53 = vsel %vm843_vm12, %v1831_v43, %v1848_v23 }
 0x242   : > { %v1893_v6 = vrot.slane %v3342_v25, 4 }
 0x244   : > { %v1898_v8 = vsel %vm338_vm6, %v1892_v4, %v1893_v6 }
 0x245   : > { %v1575_v5 = vpop.permute.xlu0 %1574  ;;  %v3351_v24 = vpop.permute.xlu1 %1932  ;;  %v1899_v57 = vsel %vm933_vm13, %v1881_v16, %v1898_v8 }
 0x246   : > { %v1584_v58 = vrot.slane %v1575_v5, 4  ;;  %v1943_v11 = vrot.slane %v3351_v24, 4  ;;  %v2662_v13 = vcombine.low %v1849_v53, %v1899_v57  ;;  %v2663_v15 = vcombine.high %v1849_v53, %v1899_v57 }
 0x248   : > { %v1948_v48 = vsel %vm338_vm6, %v1942_v10, %v1943_v11  ;;  %2286 = vmatprep.subr.bf16.mxu1 %v2663_v15  ;;  %v1590_v38 = vsel %vm338_vm6, %v1583_v27, %v1584_v58 }
 0x249   : > { %v1625_v31 = vpop.permute.xlu0 %1624  ;;  %2287 = vmatpush1.bf16.msra.mxu1 %v2662_v13  ;;  %v3360_v19 = vpop.permute.xlu1 %1576  ;;  %v1949_v20 = vsel %vm1023_vm14, %v1931_v1, %v1948_v48 }
 0x24a   : > { %v1634_v9 = vrot.slane %v1625_v31, 4  ;;  %v1585_v28 = vrot.slane %v3360_v19, 4  ;;  %v2673_v60 = vcombine.high %v1949_v20, %v1949_v20  ;;  %v2672_v33 = vcombine.low %v1949_v20, %v1949_v20 }
 0x24c   : > { %v1640_v54 = vsel %vm338_vm6, %v1633_v7, %v1634_v9  ;;  %2682 = vmatprep.subr.msk.bf16.mxu1 %vm338_vm6, %v2673_v60  ;;  %v2251_v37 = vsel %vm338_vm6, %v2672_v33, 0  ;;  %v1592_v27 = vsel %vm338_vm6, %v1584_v58, %v1585_v28  ;;  %v1591_v7 = vsel %vm340_vm10, %v3304_v32, %v1590_v38 }
 0x24d   : > { %v1675_v39 = vpop.permute.xlu0 %1674  ;;  %2289 = vmatpush1.bf16.msra.mxu1 %v2251_v37  ;;  %v3372_v51 = vpop.permute.xlu1 %1626  ;;  %v1641_v42 = vsel %vm430_vm7, %v3307_v29, %v1640_v54  ;;  %v1593_v49 = vsel %vm340_vm10, %v1575_v5, %v1592_v27 }
 0x24e   : > { %v1684_v36 = vrot.slane %v1675_v39, 4  ;;  %v1635_v43 = vrot.slane %v3372_v51, 4  ;;  %v2634_v30 = vcombine.low %v1591_v7, %v1641_v42  ;;  %v2635_v45 = vcombine.high %v1591_v7, %v1641_v42 }
 0x250   : > { %v1642_v59 = vsel %vm338_vm6, %v1634_v9, %v1635_v43  ;;  %2683 = vmatmul.mubr.msk.bf16.vlgmr.msra.gmra.mrb[8].mxu1 %vm2245_vm0, %v3377_v35  ;;  %2321 = vmatprep.subr.bf16.mxu0 %v2635_v45  ;;  %v1690_v32 = vsel %vm338_vm6, %v1683_v40, %v1684_v36 }
 0x251   : > { %v1725_v34 = vpop.permute.xlu0 %1724  ;;  %2322 = vmatpush1.bf16.msra.mxu0 %v2634_v30  ;;  %v3392_v29 = vpop.permute.xlu1 %1676  ;;  %v1643_v41 = vsel %vm430_vm7, %v1625_v31, %v1642_v59  ;;  %2394 = vmatprep.mubr.bf16.mxu1 %v2784_v3  ;;  %v1691_v12 = vsel %vm520_vm8, %v3314_v52, %v1690_v32 }
 0x252   : > { %v1734_v2 = vrot.slane %v1725_v34, 4  ;;  %v1685_v50 = vrot.slane %v3392_v29, 4  ;;  %v2636_v16 = vcombine.low %v1593_v49, %v1643_v41  ;;  %v2637_v18 = vcombine.high %v1593_v49, %v1643_v41 }
 0x254   : > { %v1740_v61 = vsel %vm338_vm6, %v1733_v47, %v1734_v2  ;;  %2362 = vmatprep.subr.bf16.mxu1 %v2637_v18  ;;  %v1692_v40 = vsel %vm338_vm6, %v1684_v36, %v1685_v50 }
 0x255   : > { %v1785_v63 = vpop.permute.xlu0 %1784  ;;  %2363 = vmatpush1.bf16.msra.mxu1 %v2636_v16  ;;  %v3404_v0 = vpop.permute.xlu1 %1726  ;;  %v1741_v1 = vsel %vm610_vm9, %v3319_v22, %v1740_v61  ;;  %v1693_v57 = vsel %vm520_vm8, %v1675_v39, %v1692_v40 }
 0x256   : > { %v1794_v4 = vrot.slane %v1785_v63, 4  ;;  %v1735_v23 = vrot.slane %v3404_v0, 4  ;;  %v2644_v8 = vcombine.low %v1691_v12, %v1741_v1  ;;  %v2645_v47 = vcombine.high %v1691_v12, %v1741_v1 }
 0x258   : > { %v1800_v10 = vsel %vm338_vm6, %v1793_v56, %v1794_v4  ;;  %v1742_v5 = vsel %vm338_vm6, %v1734_v2, %v1735_v23  ;;  %2323 = vmatprep.subr.bf16.mxu0 %v2645_v47 }
 0x259   : > { %v1835_v53 = vpop.permute.xlu0 %1834  ;;  %2324 = vmatpush1.bf16.msra.mxu0 %v2644_v8  ;;  %v3417_v52 = vpop.permute.xlu1 %1786  ;;  %v1801_v22 = vsel %vm753_vm11, %v3328_v46, %v1800_v10  ;;  %v1743_v58 = vsel %vm610_vm9, %v1725_v34, %v1742_v5 }
 0x25a   : > { %v1844_v13 = vrot.slane %v1835_v53, 4  ;;  %v1795_v15 = vrot.slane %v3417_v52, 4  ;;  %v2654_v56 = vcombine.low %v3202_v26, %v1801_v22  ;;  %v2655_v48 = vcombine.high %v3202_v26, %v1801_v22 }
 0x25b   : > { %v2646_v38 = vcombine.low %v1693_v57, %v1743_v58  ;;  %v2647_v31 = vcombine.high %v1693_v57, %v1743_v58 }
 0x25c   : > { %v1802_v20 = vsel %vm338_vm6, %v1794_v4, %v1795_v15  ;;  %2325 = vmatprep.subr.bf16.mxu0 %v2655_v48  ;;  %v1850_v46 = vsel %vm338_vm6, %v1843_v62, %v1844_v13 }
 0x25d   : > { %2364 = vmatprep.subr.bf16.mxu1 %v2647_v31  ;;  %v1885_v9 = vpop.permute.xlu0 %1884  ;;  %2326 = vmatpush1.bf16.msra.mxu0 %v2654_v56  ;;  %v3432_v60 = vpop.permute.xlu1 %1836  ;;  %v1803_v33 = vsel %vm753_vm11, %v1785_v63, %v1802_v20  ;;  %v1851_v36 = vsel %vm843_vm12, %v3336_v14, %v1850_v46 }
 0x25e   : > { %v1894_v54 = vrot.slane %v1885_v9, 4  ;;  %2365 = vmatpush1.bf16.msra.mxu1 %v2646_v38  ;;  %v1845_v26 = vrot.slane %v3432_v60, 4  ;;  %v2656_v37 = vcombine.low %v3230_v55, %v1803_v33  ;;  %v2657_v27 = vcombine.high %v3230_v55, %v1803_v33 }
 0x260   : > { %v1900_v39 = vsel %vm338_vm6, %v1893_v6, %v1894_v54  ;;  %2366 = vmatprep.subr.bf16.mxu1 %v2657_v27  ;;  %v1852_v62 = vsel %vm338_vm6, %v1844_v13, %v1845_v26 }
 0x261   : > { %v1935_v7 = vpop.permute.xlu0 %1934  ;;  %v3444_v42 = vpop.permute.xlu1 %1886  ;;  %v1901_v30 = vsel %vm933_vm13, %v3342_v25, %v1900_v39  ;;  %v1853_v41 = vsel %vm843_vm12, %v1835_v53, %v1852_v62 }
 0x262   : > { %v1944_v45 = vrot.slane %v1935_v7, 4  ;;  %2367 = vmatpush1.bf16.msra.mxu1 %v2656_v37  ;;  %v1895_v55 = vrot.slane %v3444_v42, 4  ;;  %v2664_v59 = vcombine.low %v1851_v36, %v1901_v30  ;;  %v2665_v6 = vcombine.high %v1851_v36, %v1901_v30 }
 0x263   : > { %v1797_v30 = vrot.slane %v3302_v44, 4 }
 0x264   : > { %v1950_v32 = vsel %vm338_vm6, %v1943_v11, %v1944_v45  ;;  %v1902_v34 = vsel %vm338_vm6, %v1894_v54, %v1895_v55  ;;  %2327 = vmatprep.subr.bf16.mxu0 %v2665_v6 }
 0x265   : > { %v1579_v49 = vpop.permute.xlu0 %1578  ;;  %2328 = vmatpush1.bf16.msra.mxu0 %v2664_v59  ;;  %v3457_v14 = vpop.permute.xlu1 %1936  ;;  %v1951_v25 = vsel %vm1023_vm14, %v3351_v24, %v1950_v32  ;;  %v1903_v2 = vsel %vm933_vm13, %v1885_v9, %v1902_v34 }
 0x266   : > { %v1586_v16 = vrot.slane %v1579_v49, 4  ;;  %v1945_v18 = vrot.slane %v3457_v14, 4  ;;  %v2675_v11 = vcombine.high %v1951_v25, %v1951_v25  ;;  %v2666_v61 = vcombine.low %v1853_v41, %v1903_v2 }
 0x267   : > { %v2667_v40 = vcombine.high %v1853_v41, %v1903_v2  ;;  %v2674_v63 = vcombine.low %v1951_v25, %v1951_v25 }
 0x268   : > { %v1952_v12 = vsel %vm338_vm6, %v1944_v45, %v1945_v18  ;;  %2684 = vmatprep.subr.msk.bf16.mxu0 %vm338_vm6, %v2675_v11  ;;  %v1594_v24 = vsel %vm338_vm6, %v1585_v28, %v1586_v16 }
 0x269   : > { %2368 = vmatprep.subr.bf16.mxu1 %v2667_v40  ;;  %v1629_v1 = vpop.permute.xlu0 %1628  ;;  %v2257_v4 = vsel %vm338_vm6, %v2674_v63, 0  ;;  %v1581_v8 = vpop.permute.xlu1 %1580  ;;  %v1953_v47 = vsel %vm1023_vm14, %v1935_v7, %v1952_v12  ;;  %v1595_v48 = vsel %vm340_vm10, %v3360_v19, %v1594_v24 }
 0x26a   : > { %v1636_v10 = vrot.slane %v1629_v1, 4  ;;  %2330 = vmatpush1.bf16.msra.mxu0 %v2257_v4  ;;  %2369 = vmatpush1.bf16.msra.mxu1 %v2666_v61  ;;  %v1587_v5 = vrot.slane %v1581_v8, 4  ;;  %v2677_v53 = vcombine.high %v1953_v47, %v1953_v47  ;;  %v2676_v22 = vcombine.low %v1953_v47, %v1953_v47 }
 0x26c   : > { %v1644_v57 = vsel %vm338_vm6, %v1635_v43, %v1636_v10  ;;  %2686 = vmatprep.subr.msk.bf16.mxu1 %vm338_vm6, %v2677_v53  ;;  %v2263_v28 = vsel %vm338_vm6, %v2676_v22, 0  ;;  %v1596_v58 = vsel %vm338_vm6, %v1586_v16, %v1587_v5 }
 0x26d   : > { %2685 = vmatmul.mubr.msk.bf16.vlgmr.msra.gmra.mrb[12].mxu0 %vm2245_vm0, %v3377_v35  ;;  %v1679_v13 = vpop.permute.xlu0 %1678  ;;  %v1631_v56 = vpop.permute.xlu1 %1630  ;;  %v1645_v38 = vsel %vm430_vm7, %v3372_v51, %v1644_v57  ;;  %v1597_v19 = vsel %vm340_vm10, %v1579_v49, %v1596_v58 }
 0x26e   : > { %v1686_v31 = vrot.slane %v1679_v13, 4  ;;  %2371 = vmatpush1.bf16.msra.mxu1 %v2263_v28  ;;  %v1637_v43 = vrot.slane %v1631_v56, 4  ;;  %v2638_v20 = vcombine.low %v1595_v48, %v1645_v38  ;;  %v2639_v46 = vcombine.high %v1595_v48, %v1645_v38  ;;  %2435 = vmatprep.mubr.bf16.mxu0 %v2784_v3 }
 0x270   : > { %v1646_v9 = vsel %vm338_vm6, %v1636_v10, %v1637_v43  ;;  %2403 = vmatprep.subr.bf16.mxu0 %v2639_v46  ;;  %v1694_v37 = vsel %vm338_vm6, %v1685_v50, %v1686_v31 }
 0x271   : > { %2687 = vmatmul.mubr.msk.bf16.vlgmr.msra.gmra.mrb[12].mxu1 %vm2245_vm0, %v3377_v35  ;;  %v1729_v33 = vpop.permute.xlu0 %1728  ;;  %2404 = vmatpush1.bf16.msra.mxu0 %v2638_v20  ;;  %v1681_v54 = vpop.permute.xlu1 %1680  ;;  %v1647_v51 = vsel %vm430_vm7, %v1629_v1, %v1646_v9  ;;  %v1695_v6 = vsel %vm520_vm8, %v3392_v29, %v1694_v37 }
 0x272   : > { %v1736_v27 = vrot.slane %v1729_v33, 4  ;;  %v2640_v39 = vcombine.low %v1597_v19, %v1647_v51  ;;  %v2641_v62 = vcombine.high %v1597_v19, %v1647_v51  ;;  %2476 = vmatprep.mubr.bf16.mxu1 %v2784_v3  ;;  %v1687_v7 = vrot.slane %v1681_v54, 4 }
 0x274   : > { %v1744_v36 = vsel %vm338_vm6, %v1735_v23, %v1736_v27  ;;  %2444 = vmatprep.subr.bf16.mxu1 %v2641_v62  ;;  %v1696_v25 = vsel %vm338_vm6, %v1686_v31, %v1687_v7 }
 0x275   : > { %v1789_v45 = vpop.permute.xlu0 %1788  ;;  %2445 = vmatpush1.bf16.msra.mxu1 %v2640_v39  ;;  %v1731_v59 = vpop.permute.xlu1 %1730  ;;  %v1745_v50 = vsel %vm610_vm9, %v3404_v0, %v1744_v36  ;;  %v1697_v63 = vsel %vm520_vm8, %v1679_v13, %v1696_v25 }
 0x276   : > { %v1796_v32 = vrot.slane %v1789_v45, 4  ;;  %v1737_v34 = vrot.slane %v1731_v59, 4  ;;  %v2648_v3 = vcombine.low %v1695_v6, %v1745_v50  ;;  %v2649_v49 = vcombine.high %v1695_v6, %v1745_v50 }
 0x278   : > { %v1804_v23 = vsel %vm338_vm6, %v1795_v15, %v1796_v32  ;;  %v1806_v44 = vsel %vm338_vm6, %v1796_v32, %v1797_v30  ;;  %v1746_v41 = vsel %vm338_vm6, %v1736_v27, %v1737_v34  ;;  %2405 = vmatprep.subr.bf16.mxu0 %v2649_v49 }
 0x279   : > { %v1839_v2 = vpop.permute.xlu0 %1838  ;;  %2406 = vmatpush1.bf16.msra.mxu0 %v2648_v3  ;;  %v1841_v29 = vpop.permute.xlu1 %1840  ;;  %v1805_v0 = vsel %vm753_vm11, %v3417_v52, %v1804_v23  ;;  %v1747_v16 = vsel %vm610_vm9, %v1729_v33, %v1746_v41  ;;  %v1807_v11 = vsel %vm753_vm11, %v1789_v45, %v1806_v44 }
 0x27a   : > { %v1846_v61 = vrot.slane %v1839_v2, 4  ;;  %v1847_v40 = vrot.slane %v1841_v29, 4  ;;  %v2658_v15 = vcombine.low %v3232_v17, %v1805_v0  ;;  %v2659_v12 = vcombine.high %v3232_v17, %v1805_v0 }
 0x27b   : > { %v2650_v24 = vcombine.low %v1697_v63, %v1747_v16  ;;  %v2651_v1 = vcombine.high %v1697_v63, %v1747_v16  ;;  %v2661_v4 = vcombine.high %v3256_v21, %v1807_v11  ;;  %v2660_v17 = vcombine.low %v3256_v21, %v1807_v11 }
 0x27c   : > { %2407 = vmatprep.subr.bf16.mxu0 %v2659_v12  ;;  %v1854_v47 = vsel %vm338_vm6, %v1845_v26, %v1846_v61  ;;  %v1856_v10 = vsel %vm338_vm6, %v1846_v61, %v1847_v40 }
 0x27d   : > { %2446 = vmatprep.subr.bf16.mxu1 %v2651_v1  ;;  %v1889_v8 = vpop.permute.xlu0 %1888  ;;  %v1891_v52 = vpop.permute.xlu1 %1890  ;;  %2408 = vmatpush1.bf16.msra.mxu0 %v2658_v15  ;;  %v1855_v26 = vsel %vm843_vm12, %v3432_v60, %v1854_v47  ;;  %v1857_v56 = vsel %vm843_vm12, %v1839_v2, %v1856_v10 }
 0x27e   : > { %v1896_v5 = vrot.slane %v1889_v8, 4  ;;  %2447 = vmatpush1.bf16.msra.mxu1 %v2650_v24  ;;  %v1897_v53 = vrot.slane %v1891_v52, 4 }
 0x27f   : > { %2448 = vmatprep.subr.bf16.mxu1 %v2661_v4 }
 0x280   : > { %v1904_v22 = vsel %vm338_vm6, %v1895_v55, %v1896_v5  ;;  %v1906_v57 = vsel %vm338_vm6, %v1896_v5, %v1897_v53 }
 0x281   : > { %v1939_v28 = vpop.permute.xlu0 %1938  ;;  %v1941_v58 = vpop.permute.xlu1 %1940  ;;  %v1905_v13 = vsel %vm933_vm13, %v3444_v42, %v1904_v22  ;;  %v1907_v48 = vsel %vm933_vm13, %v1889_v8, %v1906_v57 }
 0x282   : > { %v1946_v38 = vrot.slane %v1939_v28, 4  ;;  %2449 = vmatpush1.bf16.msra.mxu1 %v2660_v17  ;;  %v1947_v21 = vrot.slane %v1941_v58, 4  ;;  %v2668_v31 = vcombine.low %v1855_v26, %v1905_v13  ;;  %v2669_v43 = vcombine.high %v1855_v26, %v1905_v13 }
 0x283   : > { %v2670_v55 = vcombine.low %v1857_v56, %v1907_v48  ;;  %v2671_v20 = vcombine.high %v1857_v56, %v1907_v48 }
 0x284   : > { %v1954_v46 = vsel %vm338_vm6, %v1945_v18, %v1946_v38  ;;  %v1956_v60 = vsel %vm338_vm6, %v1946_v38, %v1947_v21  ;;  %2409 = vmatprep.subr.bf16.mxu0 %v2669_v43 }
 0x285   : > { %v1957_v42 = vsel %vm1023_vm14, %v1939_v28, %v1956_v60  ;;  %2450 = vmatprep.subr.bf16.mxu1 %v2671_v20  ;;  %2410 = vmatpush1.bf16.msra.mxu0 %v2668_v31  ;;  %v1955_v9 = vsel %vm1023_vm14, %v3457_v14, %v1954_v46 }
 0x286   : > { %2451 = vmatpush1.bf16.msra.mxu1 %v2670_v55  ;;  %v2679_v33 = vcombine.high %v1955_v9, %v1955_v9  ;;  %v2681_v54 = vcombine.high %v1957_v42, %v1957_v42  ;;  %v2678_v19 = vcombine.low %v1955_v9, %v1955_v9  ;;  %v2680_v51 = vcombine.low %v1957_v42, %v1957_v42 }
 0x288   : > { %2688 = vmatprep.subr.msk.bf16.mxu0 %vm338_vm6, %v2679_v33  ;;  %2690 = vmatprep.subr.msk.bf16.mxu1 %vm338_vm6, %v2681_v54  ;;  %v2269_v18 = vsel %vm338_vm6, %v2678_v19, 0  ;;  %v2275_v37 = vsel %vm338_vm6, %v2680_v51, 0 }
 0x289   : > { %2412 = vmatpush1.bf16.msra.mxu0 %v2269_v18 }
 0x28a   : > { %2453 = vmatpush1.bf16.msra.mxu1 %v2275_v37 }
 0x28c   : > { %2689 = vmatmul.mubr.msk.bf16.vlgmr.msra.gmra.mrb[16].mxu0 %vm2245_vm0, %v3377_v35 }
 0x28d   : > { %2691 = vmatmul.mubr.msk.bf16.vlgmr.msra.gmra.mrb[16].mxu1 %vm2245_vm0, %v3377_v35 }
 0x292   : > { %v2018_v14 = vpop.permute.xlu0 %2017 }
 0x323   : > { %v2314_v27 = vpop.f32.mrb[8].mxu1 }
 0x324   : > { %v2315_v39 = vadd.f32 %v2314_v27, %v2018_v14  ;;  %v2316_v62 = vpop.f32.mrb[9].mxu1 }
 0x325   : > { %v2317_v7 = vadd.f32 %v2316_v62, %v2018_v14  ;;  %v2318_v36 = vpop.f32.mrb[10].mxu1 }
 0x326   : > { %v2485_v30 = vmax.f32 %v2315_v39, 0.0  ;;  %v2319_v45 = vpop.f32.mrb[11].mxu1 }
 0x327   : > { %v2486_v59 = vmax.f32 %v2317_v7, 0.0 }
 0x329   : > { %v2505_v6 = vcombine.low %v2485_v30, %v2486_v59 }
 0x32b   : > { %2515 = vst [vmem:[%s3551_s28] sm:$0xff] %v2505_v6 }
 0x340   : > { %v2355_v50 = vpop.f32.mrb[12].mxu0 }
 0x341   : > { %v2356_v35 = vadd.f32 %v2355_v50, %v2018_v14  ;;  %v2357_v32 = vpop.f32.mrb[13].mxu0 }
 0x342   : > { %v2358_v34 = vadd.f32 %v2357_v32, %v2018_v14  ;;  %v2359_v3 = vpop.f32.mrb[14].mxu0 }
 0x343   : > { %v2487_v49 = vmax.f32 %v2356_v35, 0.0  ;;  %v2360_v25 = vpop.f32.mrb[15].mxu0 }
 0x344   : > { %v2488_v23 = vmax.f32 %v2358_v34, 0.0  ;;  %v2396_v44 = vpop.f32.mrb[12].mxu1 }
 0x345   : > { %v2397_v41 = vadd.f32 %v2396_v44, %v2018_v14  ;;  %v2398_v2 = vpop.f32.mrb[13].mxu1 }
 0x346   : > { %v2506_v29 = vcombine.low %v2487_v49, %v2488_v23  ;;  %v2399_v0 = vadd.f32 %v2398_v2, %v2018_v14  ;;  %v2400_v16 = vpop.f32.mrb[14].mxu1 }
 0x347   : > { %v2489_v11 = vmax.f32 %v2397_v41, 0.0  ;;  %v2401_v61 = vpop.f32.mrb[15].mxu1 }
 0x348   : > { %2516 = vst [vmem:[%s3551_s28 + $0x8] sm:$0xff] %v2506_v29  ;;  %v2490_v40 = vmax.f32 %v2399_v0, 0.0 }
 0x34a   : > { %v2507_v63 = vcombine.low %v2489_v11, %v2490_v40 }
 0x34c   : > { %2517 = vst [vmem:[%s3551_s28 + $0x10] sm:$0xff] %v2507_v63 }
 0x35f   : > { %v2437_v15 = vpop.f32.mrb[16].mxu0 }
 0x360   : > { %v2438_v12 = vadd.f32 %v2437_v15, %v2018_v14  ;;  %v2478_v24 = vpop.f32.mrb[16].mxu1  ;;  %v2439_v1 = vpop.f32.mrb[17].mxu0 }
 0x361   : > { %v2479_v4 = vadd.f32 %v2478_v24, %v2018_v14  ;;  %v2440_v8 = vadd.f32 %v2439_v1, %v2018_v14  ;;  %v2480_v52 = vpop.f32.mrb[17].mxu1  ;;  %v2441_v47 = vpop.f32.mrb[18].mxu0 }
 0x362   : > { %v2491_v10 = vmax.f32 %v2438_v12, 0.0  ;;  %v2481_v5 = vadd.f32 %v2480_v52, %v2018_v14  ;;  %v2482_v53 = vpop.f32.mrb[18].mxu1  ;;  %v2442_v17 = vpop.f32.mrb[19].mxu0 }
 0x363   : > { %v2493_v22 = vmax.f32 %v2479_v4, 0.0  ;;  %v2492_v57 = vmax.f32 %v2440_v8, 0.0  ;;  %v2483_v28 = vpop.f32.mrb[19].mxu1 }
 0x364   : > { %v2494_v58 = vmax.f32 %v2481_v5, 0.0 }
 0x365   : > { %v2508_v26 = vcombine.low %v2491_v10, %v2492_v57 }
 0x366   : > { %v2509_v13 = vcombine.low %v2493_v22, %v2494_v58 }
 0x367   : > { %2518 = vst [vmem:[%s3551_s28 + $0x18] sm:$0xff] %v2508_v26 }
 0x368   : > { %2519 = vst [vmem:[%s3551_s28 + $0x20] sm:$0xff] %v2509_v13 }
 0x369 PF: > { %s16_s21 = sadd.s32 1, %s2781_s21  }
 0x36a   : > { %p13_p4 = scmp.ge.s32.totalorder %s16_s21, 4  }
 0x36c   :  { %15 = sbr.rel (!%p13_p4) target bundleno = 1 (0x1), region = 74 }

</bundles_post_ra>
